<compile_context>
chip_gen: v7x
topology: tpu7x:2x2x1
jax: 0.10.0
libtpu: 0.0.40
codegen_flags: <defaults>
</compile_context>

<pallas_src>
import functools

import jax
import jax.numpy as jnp
from jax import lax
from jax.experimental import pallas as pl
from jax.experimental.pallas import tpu as pltpu

BN_EPS = 1e-5


# ---------------------------------------------------------------------------
# Fused Pallas kernel: expand(1x1) + BN + ReLU6 -> depthwise(3x3) + BN + ReLU6
#                      -> project(1x1) + BN (+ residual), all in VMEM.
# ---------------------------------------------------------------------------
def _fused_inverted_residual_kernel(*refs, expand, use_res, stride, H, W, Ho, Wo):
    it = iter(refs)
    x_ref = next(it)                          # (1, H, W, Cin)   bf16, NHWC tile
    res_ref = next(it) if use_res else None   # (1, Cin, H*W)    bf16, NCHW view
    if expand:
        w_exp_ref = next(it)                  # (Cin, hidden)    bf16
        s_exp_ref = next(it)                  # (1, hidden)      f32
        b_exp_ref = next(it)                  # (1, hidden)      f32
    w_dw_ref = next(it)                       # (9, hidden)      f32
    s_dw_ref = next(it)                       # (1, hidden)      f32
    b_dw_ref = next(it)                       # (1, hidden)      f32
    w_proj_ref = next(it)                     # (oup, hidden)    bf16
    s_proj_ref = next(it)                     # (oup, 1)         f32
    b_proj_ref = next(it)                     # (oup, 1)         f32
    o_ref = next(it)                          # (1, oup, Ho*Wo)  f32
    hp_ref = next(it)                         # VMEM scratch (H+2, W+2, hidden)

    cin = x_ref.shape[-1]
    x2 = x_ref[0].reshape(H * W, cin)         # merge leading dims (lane dim kept)

    # --- 1x1 expand conv (bf16 MXU, f32 accumulate) + folded BN + ReLU6 ------
    if expand:
        h = jnp.dot(x2, w_exp_ref[...], preferred_element_type=jnp.float32)
        h = jnp.clip(h * s_exp_ref[...] + b_exp_ref[...], 0.0, 6.0)
    else:
        h = x2.astype(jnp.float32)            # expand_ratio == 1: hidden == Cin
    hidden = h.shape[-1]

    # --- 3x3 depthwise conv (pad=1, stride in {1,2}) + folded BN + ReLU6 -----
    # The zero halo lives purely in VMEM scratch: no HBM pad copy.
    hp_ref[...] = jnp.zeros_like(hp_ref)
    hp_ref[1:H + 1, 1:W + 1, :] = h.reshape(H, W, hidden)

    wdw = w_dw_ref[...]                                        # (9, hidden)
    acc = jnp.zeros((Ho, Wo, hidden), jnp.float32)
    for kh in range(3):
        for kw in range(3):
            if stride == 1:
                patch = hp_ref[kh:kh + Ho, kw:kw + Wo, :]
            else:
                # TODO(synk): the stride-2 path uses a sublane-strided ref
                # load (pl.ds(..., stride)); it is not exercised by the
                # stride-1 smoke tests in __main__.
                patch = hp_ref[pl.ds(kh, Ho, stride), pl.ds(kw, Wo, stride), :]
            acc = acc + patch * wdw[3 * kh + kw:3 * kh + kw + 1, :]
    y = jnp.clip(acc * s_dw_ref[...] + b_dw_ref[...], 0.0, 6.0)
    y2 = y.reshape(Ho * Wo, hidden)            # merge leading dims (lane kept)

    # --- 1x1 projection + folded BN (+ residual), channels-first so the
    #     output store is lane-dense and NCHW falls out as a free reshape. ----
    wp = w_proj_ref[...].astype(jnp.float32)                   # (oup, hidden)
    o = jnp.dot(wp, y2.T, preferred_element_type=jnp.float32)  # (oup, Ho*Wo)
    o = o * s_proj_ref[...] + b_proj_ref[...]
    if use_res:
        o = o + res_ref[0].astype(jnp.float32)
    o_ref[0] = o.astype(o_ref.dtype)


# ---------------------------------------------------------------------------
# Wrapper
# ---------------------------------------------------------------------------
def inverted_residual(x_nchw, params, *, oup, stride, expand_ratio):
    """InvertedResidual forward. x_nchw: (N, inp, H, W) float32 -> NCHW output."""
    assert stride in (1, 2)
    N, inp, H, W = x_nchw.shape
    hidden = int(round(inp * expand_ratio))
    use_res = stride == 1 and inp == oup
    expand = expand_ratio != 1
    Ho = (H + 2 - 3) // stride + 1
    Wo = (W + 2 - 3) // stride + 1

    xb = x_nchw.astype(jnp.bfloat16)
    # Channels-last view for the expand matmul.
    # TODO(synk): avoidable entirely if the surrounding network stays NHWC.
    x_nhwc = jnp.transpose(xb, (0, 2, 3, 1))

    in_specs = [pl.BlockSpec((1, H, W, inp), lambda n: (n, 0, 0, 0))]
    args = [x_nhwc]
    if use_res:
        # Residual is consumed channels-first: a free view of the NCHW input.
        in_specs.append(pl.BlockSpec((1, inp, H * W), lambda n: (n, 0, 0)))
        args.append(xb.reshape(N, inp, H * W))
    if expand:
        in_specs += [
            pl.BlockSpec((inp, hidden), lambda n: (0, 0)),
            pl.BlockSpec((1, hidden), lambda n: (0, 0)),
            pl.BlockSpec((1, hidden), lambda n: (0, 0)),
        ]
        args += [params["w_exp"], params["s_exp"], params["b_exp"]]
    in_specs += [
        pl.BlockSpec((9, hidden), lambda n: (0, 0)),
        pl.BlockSpec((1, hidden), lambda n: (0, 0)),
        pl.BlockSpec((1, hidden), lambda n: (0, 0)),
        pl.BlockSpec((oup, hidden), lambda n: (0, 0)),
        pl.BlockSpec((oup, 1), lambda n: (0, 0)),
        pl.BlockSpec((oup, 1), lambda n: (0, 0)),
    ]
    args += [params["w_dw"], params["s_dw"], params["b_dw"],
             params["w_proj"], params["s_proj"], params["b_proj"]]

    kernel = functools.partial(
        _fused_inverted_residual_kernel,
        expand=expand, use_res=use_res, stride=stride, H=H, W=W, Ho=Ho, Wo=Wo)

    # TODO(synk): at real MobileNet spatial sizes, tile H with a halo (manual
    # DMA) to bound per-step VMEM on v7x; whole-image blocks are fine here.
    o_flat = pl.pallas_call(
        kernel,
        out_shape=jax.ShapeDtypeStruct((N, oup, Ho * Wo), jnp.float32),
        grid=(N,),
        in_specs=in_specs,
        out_specs=pl.BlockSpec((1, oup, Ho * Wo), lambda n: (n, 0, 0)),
        scratch_shapes=[pltpu.VMEM((H + 2, W + 2, hidden), jnp.float32)],
        compiler_params=pltpu.CompilerParams(
            dimension_semantics=("parallel",)),
    )(*args)
    # Channels-first kernel output => NCHW is a free reshape (no transpose).
    return o_flat.reshape(N, oup, Ho, Wo)


# ---------------------------------------------------------------------------
# Parameters (BatchNorm in eval mode is folded into per-channel scale/bias).
# ---------------------------------------------------------------------------
def fold_bn(gamma, beta, mean, var):
    scale = gamma / jnp.sqrt(var + BN_EPS)
    bias = beta - mean * scale
    return scale, bias


def init_params(key, inp, oup, expand_ratio):
    hidden = int(round(inp * expand_ratio))
    keys = jax.random.split(key, 16)
    p = {}
    i = 0

    def bn(c):
        nonlocal i
        gamma = 1.0 + 0.1 * jax.random.normal(keys[i], (c,), jnp.float32); i += 1
        beta = 0.1 * jax.random.normal(keys[i], (c,), jnp.float32); i += 1
        mean = 0.1 * jax.random.normal(keys[i], (c,), jnp.float32); i += 1
        var = 0.5 + jax.random.uniform(keys[i], (c,), jnp.float32); i += 1
        return fold_bn(gamma, beta, mean, var)

    if expand_ratio != 1:
        # PyTorch Conv2d weight (hidden, inp, 1, 1) stored transposed: (inp, hidden).
        p["w_exp"] = (0.2 * jax.random.normal(keys[i], (inp, hidden),
                                              jnp.float32)).astype(jnp.bfloat16); i += 1
        s, b = bn(hidden)
        p["s_exp"] = s.reshape(1, hidden); p["b_exp"] = b.reshape(1, hidden)
    # Depthwise weight (hidden, 1, 3, 3) stored tap-major: (9, hidden), f32.
    p["w_dw"] = 0.2 * jax.random.normal(keys[i], (9, hidden), jnp.float32); i += 1
    s, b = bn(hidden)
    p["s_dw"] = s.reshape(1, hidden); p["b_dw"] = b.reshape(1, hidden)
    # Projection weight (oup, hidden, 1, 1) stored as (oup, hidden) (PyTorch layout).
    p["w_proj"] = (0.2 * jax.random.normal(keys[i], (oup, hidden),
                                           jnp.float32)).astype(jnp.bfloat16); i += 1
    s, b = bn(oup)
    p["s_proj"] = s.reshape(oup, 1); p["b_proj"] = b.reshape(oup, 1)
    return p


# ---------------------------------------------------------------------------
# Pure-JAX reference (same math, same bf16 parameter/input rounding).
# ---------------------------------------------------------------------------
def reference(x_nchw, params, *, oup, stride, expand_ratio):
    N, inp, H, W = x_nchw.shape
    hidden = int(round(inp * expand_ratio))
    use_res = stride == 1 and inp == oup
    hi = lax.Precision.HIGHEST

    x = jnp.transpose(x_nchw.astype(jnp.bfloat16).astype(jnp.float32),
                      (0, 2, 3, 1))                         # NHWC, bf16-rounded
    h = x
    if expand_ratio != 1:
        w = params["w_exp"].astype(jnp.float32)
        h = jnp.einsum("nhwc,cd->nhwd", h, w, precision=hi)
        h = jnp.clip(h * params["s_exp"].reshape(-1) + params["b_exp"].reshape(-1),
                     0.0, 6.0)
    dw = params["w_dw"].reshape(3, 3, hidden)[:, :, None, :]  # HWIO
    h = lax.conv_general_dilated(
        h, dw, window_strides=(stride, stride), padding=((1, 1), (1, 1)),
        dimension_numbers=("NHWC", "HWIO", "NHWC"),
        feature_group_count=hidden, precision=hi)
    h = jnp.clip(h * params["s_dw"].reshape(-1) + params["b_dw"].reshape(-1),
                 0.0, 6.0)
    wp = params["w_proj"].astype(jnp.float32)                 # (oup, hidden)
    o = jnp.einsum("nhwc,dc->nhwd", h, wp, precision=hi)
    o = o * params["s_proj"].reshape(-1) + params["b_proj"].reshape(-1)
    if use_res:
        o = o + x
    return jnp.transpose(o, (0, 3, 1, 2))


if __name__ == "__main__":
    key = jax.random.PRNGKey(0)
    k1, k2, k3, k4 = jax.random.split(key, 4)

    # Config A: expand branch active + residual (inp == oup, stride 1).
    INP, OUP, STRIDE, EXPAND = 8, 8, 1, 4          # hidden = 32
    x = jax.random.normal(k1, (2, INP, 16, 16), jnp.float32)   # NCHW
    params = init_params(k2, INP, OUP, EXPAND)
    out = inverted_residual(x, params, oup=OUP, stride=STRIDE,
                            expand_ratio=EXPAND)
    out = jax.block_until_ready(out)
    ref = reference(x, params, oup=OUP, stride=STRIDE, expand_ratio=EXPAND)
    assert out.shape == (2, OUP, 16, 16)
    # bf16 storage of x / pointwise weights + MXU accumulation differences keep
    # the kernel within ~1e-4 of the f32 reference in practice; margin below.
    assert jnp.max(jnp.abs(out - ref)) < 2e-2, "config A mismatch vs reference"

    # Config B: expand_ratio == 1 branch (no expand conv, no residual).
    INP, OUP, STRIDE, EXPAND = 16, 8, 1, 1         # hidden = 16
    x = jax.random.normal(k3, (2, INP, 16, 16), jnp.float32)
    params = init_params(k4, INP, OUP, EXPAND)
    out = inverted_residual(x, params, oup=OUP, stride=STRIDE,
                            expand_ratio=EXPAND)
    out = jax.block_until_ready(out)
    ref = reference(x, params, oup=OUP, stride=STRIDE, expand_ratio=EXPAND)
    assert out.shape == (2, OUP, 16, 16)
    assert jnp.max(jnp.abs(out - ref)) < 2e-2, "config B mismatch vs reference"

    print("KERNEL_OK")
</pallas_src>

<mosaic_0001>
module attributes {stable_mosaic.version = 11 : i64} {
  func.func @_fused_inverted_residual_kernel(%arg0: i32, %arg1: memref<1x16x16x8xbf16, #tpu.memory_space<vmem>>, %arg2: memref<1x8x256xbf16, #tpu.memory_space<vmem>>, %arg3: memref<8x32xbf16, #tpu.memory_space<vmem>>, %arg4: memref<1x32xf32, #tpu.memory_space<vmem>>, %arg5: memref<1x32xf32, #tpu.memory_space<vmem>>, %arg6: memref<9x32xf32, #tpu.memory_space<vmem>>, %arg7: memref<1x32xf32, #tpu.memory_space<vmem>>, %arg8: memref<1x32xf32, #tpu.memory_space<vmem>>, %arg9: memref<8x32xbf16, #tpu.memory_space<vmem>>, %arg10: memref<8x1xf32, #tpu.memory_space<vmem>>, %arg11: memref<8x1xf32, #tpu.memory_space<vmem>>, %arg12: memref<1x8x256xf32, #tpu.memory_space<vmem>>, %arg13: memref<18x18x32xf32, #tpu.memory_space<vmem>>) attributes {dimension_semantics = [#tpu.dimension_semantics<parallel>], iteration_bounds = array<i64: 2>, scalar_prefetch = 0 : i64, scratch_operands = 1 : i64, tpu.core_type = #tpu.core_type<tc>, window_params = [{transform_indices = @transform_0, window_bounds = array<i64: 1, 16, 16, 8>}, {transform_indices = @transform_1, window_bounds = array<i64: 1, 8, 256>}, {pipeline_mode = #tpu.pipeline_mode<synchronous>, transform_indices = @transform_2, window_bounds = array<i64: 8, 32>}, {pipeline_mode = #tpu.pipeline_mode<synchronous>, transform_indices = @transform_3, window_bounds = array<i64: 1, 32>}, {pipeline_mode = #tpu.pipeline_mode<synchronous>, transform_indices = @transform_4, window_bounds = array<i64: 1, 32>}, {pipeline_mode = #tpu.pipeline_mode<synchronous>, transform_indices = @transform_5, window_bounds = array<i64: 9, 32>}, {pipeline_mode = #tpu.pipeline_mode<synchronous>, transform_indices = @transform_6, window_bounds = array<i64: 1, 32>}, {pipeline_mode = #tpu.pipeline_mode<synchronous>, transform_indices = @transform_7, window_bounds = array<i64: 1, 32>}, {pipeline_mode = #tpu.pipeline_mode<synchronous>, transform_indices = @transform_8, window_bounds = array<i64: 8, 32>}, {pipeline_mode = #tpu.pipeline_mode<synchronous>, transform_indices = @transform_9, window_bounds = array<i64: 8, 1>}, {pipeline_mode = #tpu.pipeline_mode<synchronous>, transform_indices = @transform_10, window_bounds = array<i64: 8, 1>}, {transform_indices = @transform_11, window_bounds = array<i64: 1, 8, 256>}]} {
    %c0 = arith.constant 0 : index
    %c0_0 = arith.constant 0 : index
    %c0_1 = arith.constant 0 : index
    %c0_2 = arith.constant 0 : index
    %0 = vector.load %arg1[%c0, %c0_0, %c0_1, %c0_2] : memref<1x16x16x8xbf16, #tpu.memory_space<vmem>>, vector<1x16x16x8xbf16>
    %1 = vector.shape_cast %0 : vector<1x16x16x8xbf16> to vector<16x16x8xbf16>
    %2 = vector.shape_cast %1 : vector<16x16x8xbf16> to vector<256x8xbf16>
    %c0_3 = arith.constant 0 : index
    %c0_4 = arith.constant 0 : index
    %3 = vector.load %arg3[%c0_3, %c0_4] : memref<8x32xbf16, #tpu.memory_space<vmem>>, vector<8x32xbf16>
    %cst = arith.constant dense<0.000000e+00> : vector<256x32xf32>
    %4 = tpu.matmul %2, %3, %cst {dimension_numbers = #tpu.dot_dimension_numbers<[1], [0], [0], [1], [0, 0, 1, 1], [], []>} : vector<256x8xbf16>, vector<8x32xbf16>, vector<256x32xf32> -> vector<256x32xf32>
    %c0_5 = arith.constant 0 : index
    %c0_6 = arith.constant 0 : index
    %5 = vector.load %arg4[%c0_5, %c0_6] : memref<1x32xf32, #tpu.memory_space<vmem>>, vector<1x32xf32>
    %6 = vector.broadcast %5 : vector<1x32xf32> to vector<256x32xf32>
    %7 = arith.mulf %4, %6 : vector<256x32xf32>
    %c0_7 = arith.constant 0 : index
    %c0_8 = arith.constant 0 : index
    %8 = vector.load %arg5[%c0_7, %c0_8] : memref<1x32xf32, #tpu.memory_space<vmem>>, vector<1x32xf32>
    %9 = vector.broadcast %8 : vector<1x32xf32> to vector<256x32xf32>
    %10 = arith.addf %7, %9 : vector<256x32xf32>
    %cst_9 = arith.constant 0.000000e+00 : f32
    %cst_10 = arith.constant 6.000000e+00 : f32
    %11 = vector.broadcast %cst_9 : f32 to vector<256x32xf32>
    %12 = arith.maximumf %11, %10 : vector<256x32xf32>
    %13 = vector.broadcast %cst_10 : f32 to vector<256x32xf32>
    %14 = arith.minimumf %13, %12 : vector<256x32xf32>
    %cst_11 = arith.constant 0.000000e+00 : f32
    %15 = vector.broadcast %cst_11 : f32 to vector<18x18x32xf32>
    %c0_12 = arith.constant 0 : index
    %c0_13 = arith.constant 0 : index
    %c0_14 = arith.constant 0 : index
    %16 = vector.load %arg13[%c0_12, %c0_13, %c0_14] : memref<18x18x32xf32, #tpu.memory_space<vmem>>, vector<18x18x32xf32>
    tpu.vector_store %arg13[%c0_12, %c0_13, %c0_14], %15 {strides = array<i32>} : memref<18x18x32xf32, #tpu.memory_space<vmem>>, vector<18x18x32xf32>,
    %17 = vector.shape_cast %14 : vector<256x32xf32> to vector<16x16x32xf32>
    %c1 = arith.constant 1 : index
    %c1_15 = arith.constant 1 : index
    %c0_16 = arith.constant 0 : index
    %18 = vector.load %arg13[%c1, %c1_15, %c0_16] : memref<18x18x32xf32, #tpu.memory_space<vmem>>, vector<16x16x32xf32>
    tpu.vector_store %arg13[%c1, %c1_15, %c0_16], %17 {strides = array<i32>} : memref<18x18x32xf32, #tpu.memory_space<vmem>>, vector<16x16x32xf32>,
    %c0_17 = arith.constant 0 : index
    %c0_18 = arith.constant 0 : index
    %19 = vector.load %arg6[%c0_17, %c0_18] : memref<9x32xf32, #tpu.memory_space<vmem>>, vector<9x32xf32>
    %cst_19 = arith.constant 0.000000e+00 : f32
    %20 = vector.broadcast %cst_19 : f32 to vector<16x16x32xf32>
    %c0_20 = arith.constant 0 : index
    %c0_21 = arith.constant 0 : index
    %c0_22 = arith.constant 0 : index
    %21 = vector.load %arg13[%c0_20, %c0_21, %c0_22] : memref<18x18x32xf32, #tpu.memory_space<vmem>>, vector<16x16x32xf32>
    %22 = vector.extract_strided_slice %19 {offsets = [0, 0], sizes = [1, 32], strides = [1, 1]} : vector<9x32xf32> to vector<1x32xf32>
    %23 = vector.shape_cast %22 : vector<1x32xf32> to vector<1x1x32xf32>
    %24 = vector.broadcast %23 : vector<1x1x32xf32> to vector<16x16x32xf32>
    %25 = arith.mulf %21, %24 : vector<16x16x32xf32>
    %26 = arith.addf %20, %25 : vector<16x16x32xf32>
    %c0_23 = arith.constant 0 : index
    %c1_24 = arith.constant 1 : index
    %c0_25 = arith.constant 0 : index
    %27 = vector.load %arg13[%c0_23, %c1_24, %c0_25] : memref<18x18x32xf32, #tpu.memory_space<vmem>>, vector<16x16x32xf32>
    %28 = vector.extract_strided_slice %19 {offsets = [1, 0], sizes = [1, 32], strides = [1, 1]} : vector<9x32xf32> to vector<1x32xf32>
    %29 = vector.shape_cast %28 : vector<1x32xf32> to vector<1x1x32xf32>
    %30 = vector.broadcast %29 : vector<1x1x32xf32> to vector<16x16x32xf32>
    %31 = arith.mulf %27, %30 : vector<16x16x32xf32>
    %32 = arith.addf %26, %31 : vector<16x16x32xf32>
    %c0_26 = arith.constant 0 : index
    %c2 = arith.constant 2 : index
    %c0_27 = arith.constant 0 : index
    %33 = vector.load %arg13[%c0_26, %c2, %c0_27] : memref<18x18x32xf32, #tpu.memory_space<vmem>>, vector<16x16x32xf32>
    %34 = vector.extract_strided_slice %19 {offsets = [2, 0], sizes = [1, 32], strides = [1, 1]} : vector<9x32xf32> to vector<1x32xf32>
    %35 = vector.shape_cast %34 : vector<1x32xf32> to vector<1x1x32xf32>
    %36 = vector.broadcast %35 : vector<1x1x32xf32> to vector<16x16x32xf32>
    %37 = arith.mulf %33, %36 : vector<16x16x32xf32>
    %38 = arith.addf %32, %37 : vector<16x16x32xf32>
    %c1_28 = arith.constant 1 : index
    %c0_29 = arith.constant 0 : index
    %c0_30 = arith.constant 0 : index
    %39 = vector.load %arg13[%c1_28, %c0_29, %c0_30] : memref<18x18x32xf32, #tpu.memory_space<vmem>>, vector<16x16x32xf32>
    %40 = vector.extract_strided_slice %19 {offsets = [3, 0], sizes = [1, 32], strides = [1, 1]} : vector<9x32xf32> to vector<1x32xf32>
    %41 = vector.shape_cast %40 : vector<1x32xf32> to vector<1x1x32xf32>
    %42 = vector.broadcast %41 : vector<1x1x32xf32> to vector<16x16x32xf32>
    %43 = arith.mulf %39, %42 : vector<16x16x32xf32>
    %44 = arith.addf %38, %43 : vector<16x16x32xf32>
    %c1_31 = arith.constant 1 : index
    %c1_32 = arith.constant 1 : index
    %c0_33 = arith.constant 0 : index
    %45 = vector.load %arg13[%c1_31, %c1_32, %c0_33] : memref<18x18x32xf32, #tpu.memory_space<vmem>>, vector<16x16x32xf32>
    %46 = vector.extract_strided_slice %19 {offsets = [4, 0], sizes = [1, 32], strides = [1, 1]} : vector<9x32xf32> to vector<1x32xf32>
    %47 = vector.shape_cast %46 : vector<1x32xf32> to vector<1x1x32xf32>
    %48 = vector.broadcast %47 : vector<1x1x32xf32> to vector<16x16x32xf32>
    %49 = arith.mulf %45, %48 : vector<16x16x32xf32>
    %50 = arith.addf %44, %49 : vector<16x16x32xf32>
    %c1_34 = arith.constant 1 : index
    %c2_35 = arith.constant 2 : index
    %c0_36 = arith.constant 0 : index
    %51 = vector.load %arg13[%c1_34, %c2_35, %c0_36] : memref<18x18x32xf32, #tpu.memory_space<vmem>>, vector<16x16x32xf32>
    %52 = vector.extract_strided_slice %19 {offsets = [5, 0], sizes = [1, 32], strides = [1, 1]} : vector<9x32xf32> to vector<1x32xf32>
    %53 = vector.shape_cast %52 : vector<1x32xf32> to vector<1x1x32xf32>
    %54 = vector.broadcast %53 : vector<1x1x32xf32> to vector<16x16x32xf32>
    %55 = arith.mulf %51, %54 : vector<16x16x32xf32>
    %56 = arith.addf %50, %55 : vector<16x16x32xf32>
    %c2_37 = arith.constant 2 : index
    %c0_38 = arith.constant 0 : index
    %c0_39 = arith.constant 0 : index
    %57 = vector.load %arg13[%c2_37, %c0_38, %c0_39] : memref<18x18x32xf32, #tpu.memory_space<vmem>>, vector<16x16x32xf32>
    %58 = vector.extract_strided_slice %19 {offsets = [6, 0], sizes = [1, 32], strides = [1, 1]} : vector<9x32xf32> to vector<1x32xf32>
    %59 = vector.shape_cast %58 : vector<1x32xf32> to vector<1x1x32xf32>
    %60 = vector.broadcast %59 : vector<1x1x32xf32> to vector<16x16x32xf32>
    %61 = arith.mulf %57, %60 : vector<16x16x32xf32>
    %62 = arith.addf %56, %61 : vector<16x16x32xf32>
    %c2_40 = arith.constant 2 : index
    %c1_41 = arith.constant 1 : index
    %c0_42 = arith.constant 0 : index
    %63 = vector.load %arg13[%c2_40, %c1_41, %c0_42] : memref<18x18x32xf32, #tpu.memory_space<vmem>>, vector<16x16x32xf32>
    %64 = vector.extract_strided_slice %19 {offsets = [7, 0], sizes = [1, 32], strides = [1, 1]} : vector<9x32xf32> to vector<1x32xf32>
    %65 = vector.shape_cast %64 : vector<1x32xf32> to vector<1x1x32xf32>
    %66 = vector.broadcast %65 : vector<1x1x32xf32> to vector<16x16x32xf32>
    %67 = arith.mulf %63, %66 : vector<16x16x32xf32>
    %68 = arith.addf %62, %67 : vector<16x16x32xf32>
    %c2_43 = arith.constant 2 : index
    %c2_44 = arith.constant 2 : index
    %c0_45 = arith.constant 0 : index
    %69 = vector.load %arg13[%c2_43, %c2_44, %c0_45] : memref<18x18x32xf32, #tpu.memory_space<vmem>>, vector<16x16x32xf32>
    %70 = vector.extract_strided_slice %19 {offsets = [8, 0], sizes = [1, 32], strides = [1, 1]} : vector<9x32xf32> to vector<1x32xf32>
    %71 = vector.shape_cast %70 : vector<1x32xf32> to vector<1x1x32xf32>
    %72 = vector.broadcast %71 : vector<1x1x32xf32> to vector<16x16x32xf32>
    %73 = arith.mulf %69, %72 : vector<16x16x32xf32>
    %74 = arith.addf %68, %73 : vector<16x16x32xf32>
    %c0_46 = arith.constant 0 : index
    %c0_47 = arith.constant 0 : index
    %75 = vector.load %arg7[%c0_46, %c0_47] : memref<1x32xf32, #tpu.memory_space<vmem>>, vector<1x32xf32>
    %76 = vector.shape_cast %75 : vector<1x32xf32> to vector<1x1x32xf32>
    %77 = vector.broadcast %76 : vector<1x1x32xf32> to vector<16x16x32xf32>
    %78 = arith.mulf %74, %77 : vector<16x16x32xf32>
    %c0_48 = arith.constant 0 : index
    %c0_49 = arith.constant 0 : index
    %79 = vector.load %arg8[%c0_48, %c0_49] : memref<1x32xf32, #tpu.memory_space<vmem>>, vector<1x32xf32>
    %80 = vector.shape_cast %79 : vector<1x32xf32> to vector<1x1x32xf32>
    %81 = vector.broadcast %80 : vector<1x1x32xf32> to vector<16x16x32xf32>
    %82 = arith.addf %78, %81 : vector<16x16x32xf32>
    %cst_50 = arith.constant 0.000000e+00 : f32
    %cst_51 = arith.constant 6.000000e+00 : f32
    %83 = vector.broadcast %cst_50 : f32 to vector<16x16x32xf32>
    %84 = arith.maximumf %83, %82 : vector<16x16x32xf32>
    %85 = vector.broadcast %cst_51 : f32 to vector<16x16x32xf32>
    %86 = arith.minimumf %85, %84 : vector<16x16x32xf32>
    %87 = vector.shape_cast %86 : vector<16x16x32xf32> to vector<256x32xf32>
    %c0_52 = arith.constant 0 : index
    %c0_53 = arith.constant 0 : index
    %88 = vector.load %arg9[%c0_52, %c0_53] : memref<8x32xbf16, #tpu.memory_space<vmem>>, vector<8x32xbf16>
    %89 = arith.extf %88 : vector<8x32xbf16> to vector<8x32xf32>
    %90 = tpu.transpose %87, [1, 0] : vector<256x32xf32> -> vector<32x256xf32>
    %cst_54 = arith.constant dense<0.000000e+00> : vector<8x256xf32>
    %91 = tpu.matmul %89, %90, %cst_54 {dimension_numbers = #tpu.dot_dimension_numbers<[1], [0], [0], [1], [0, 0, 1, 1], [], []>} : vector<8x32xf32>, vector<32x256xf32>, vector<8x256xf32> -> vector<8x256xf32>
    %c0_55 = arith.constant 0 : index
    %c0_56 = arith.constant 0 : index
    %92 = vector.load %arg10[%c0_55, %c0_56] : memref<8x1xf32, #tpu.memory_space<vmem>>, vector<8x1xf32>
    %93 = vector.broadcast %92 : vector<8x1xf32> to vector<8x256xf32>
    %94 = arith.mulf %91, %93 : vector<8x256xf32>
    %c0_57 = arith.constant 0 : index
    %c0_58 = arith.constant 0 : index
    %95 = vector.load %arg11[%c0_57, %c0_58] : memref<8x1xf32, #tpu.memory_space<vmem>>, vector<8x1xf32>
    %96 = vector.broadcast %95 : vector<8x1xf32> to vector<8x256xf32>
    %97 = arith.addf %94, %96 : vector<8x256xf32>
    %c0_59 = arith.constant 0 : index
    %c0_60 = arith.constant 0 : index
    %c0_61 = arith.constant 0 : index
    %98 = vector.load %arg2[%c0_59, %c0_60, %c0_61] : memref<1x8x256xbf16, #tpu.memory_space<vmem>>, vector<1x8x256xbf16>
    %99 = vector.shape_cast %98 : vector<1x8x256xbf16> to vector<8x256xbf16>
    %100 = arith.extf %99 : vector<8x256xbf16> to vector<8x256xf32>
    %101 = arith.addf %97, %100 : vector<8x256xf32>
    %c0_62 = arith.constant 0 : index
    %c0_63 = arith.constant 0 : index
    %c0_64 = arith.constant 0 : index
    %102 = vector.load %arg12[%c0_62, %c0_63, %c0_64] : memref<1x8x256xf32, #tpu.memory_space<vmem>>, vector<1x8x256xf32>
    %103 = vector.shape_cast %102 : vector<1x8x256xf32> to vector<8x256xf32>
    %104 = vector.shape_cast %101 : vector<8x256xf32> to vector<1x8x256xf32>
    tpu.vector_store %arg12[%c0_62, %c0_63, %c0_64], %104 {strides = array<i32>} : memref<1x8x256xf32, #tpu.memory_space<vmem>>, vector<1x8x256xf32>,
    return
  }
  func.func @transform_0(%arg0: i32) -> (i32, i32, i32, i32) {
    %c0_i32 = arith.constant 0 : i32
    %c0_i32_0 = arith.constant 0 : i32
    %c0_i32_1 = arith.constant 0 : i32
    %c0_i32_2 = arith.constant 0 : i32
    return %arg0, %c0_i32, %c0_i32_0, %c0_i32_1 : i32, i32, i32, i32
  }
  func.func @transform_1(%arg0: i32) -> (i32, i32, i32) {
    %c0_i32 = arith.constant 0 : i32
    %c0_i32_0 = arith.constant 0 : i32
    %c0_i32_1 = arith.constant 0 : i32
    return %arg0, %c0_i32, %c0_i32_0 : i32, i32, i32
  }
  func.func @transform_2(%arg0: i32) -> (i32, i32) {
    %c0_i32 = arith.constant 0 : i32
    %c0_i32_0 = arith.constant 0 : i32
    %c0_i32_1 = arith.constant 0 : i32
    return %c0_i32, %c0_i32_0 : i32, i32
  }
  func.func @transform_3(%arg0: i32) -> (i32, i32) {
    %c0_i32 = arith.constant 0 : i32
    %c0_i32_0 = arith.constant 0 : i32
    %c0_i32_1 = arith.constant 0 : i32
    return %c0_i32, %c0_i32_0 : i32, i32
  }
  func.func @transform_4(%arg0: i32) -> (i32, i32) {
    %c0_i32 = arith.constant 0 : i32
    %c0_i32_0 = arith.constant 0 : i32
    %c0_i32_1 = arith.constant 0 : i32
    return %c0_i32, %c0_i32_0 : i32, i32
  }
  func.func @transform_5(%arg0: i32) -> (i32, i32) {
    %c0_i32 = arith.constant 0 : i32
    %c0_i32_0 = arith.constant 0 : i32
    %c0_i32_1 = arith.constant 0 : i32
    return %c0_i32, %c0_i32_0 : i32, i32
  }
  func.func @transform_6(%arg0: i32) -> (i32, i32) {
    %c0_i32 = arith.constant 0 : i32
    %c0_i32_0 = arith.constant 0 : i32
    %c0_i32_1 = arith.constant 0 : i32
    return %c0_i32, %c0_i32_0 : i32, i32
  }
  func.func @transform_7(%arg0: i32) -> (i32, i32) {
    %c0_i32 = arith.constant 0 : i32
    %c0_i32_0 = arith.constant 0 : i32
    %c0_i32_1 = arith.constant 0 : i32
    return %c0_i32, %c0_i32_0 : i32, i32
  }
  func.func @transform_8(%arg0: i32) -> (i32, i32) {
    %c0_i32 = arith.constant 0 : i32
    %c0_i32_0 = arith.constant 0 : i32
    %c0_i32_1 = arith.constant 0 : i32
    return %c0_i32, %c0_i32_0 : i32, i32
  }
  func.func @transform_9(%arg0: i32) -> (i32, i32) {
    %c0_i32 = arith.constant 0 : i32
    %c0_i32_0 = arith.constant 0 : i32
    %c0_i32_1 = arith.constant 0 : i32
    return %c0_i32, %c0_i32_0 : i32, i32
  }
  func.func @transform_10(%arg0: i32) -> (i32, i32) {
    %c0_i32 = arith.constant 0 : i32
    %c0_i32_0 = arith.constant 0 : i32
    %c0_i32_1 = arith.constant 0 : i32
    return %c0_i32, %c0_i32_0 : i32, i32
  }
  func.func @transform_11(%arg0: i32) -> (i32, i32, i32) {
    %c0_i32 = arith.constant 0 : i32
    %c0_i32_0 = arith.constant 0 : i32
    %c0_i32_1 = arith.constant 0 : i32
    return %arg0, %c0_i32, %c0_i32_0 : i32, i32, i32
  }
}

</mosaic_0001>

<bundles_post_ra>
// kernel: tpu_custom_call.1
= control target key start
LH: loop header
LB: loop body
LE: loop exit
PB: predicated region body
PF: predicated region fallthrough
CT: control target
= control target key end

     0   :  { %s3923_s0 = inlined_call_operand.vmem [shape: bf16[2,16,16,8], index: 0, kind: input, shape index: {}]   ;;  %s3924_s1 = inlined_call_operand.vmem [shape: bf16[2,8,256], index: 1, kind: input, shape index: {}]   ;;  %s3925_s2 = inlined_call_operand.vmem [shape: bf16[8,32], index: 2, kind: input, shape index: {}]   ;;  %s3926_s3 = inlined_call_operand.vmem [shape: f32[1,32], index: 3, kind: input, shape index: {}]   ;;  %s3927_s4 = inlined_call_operand.vmem [shape: f32[1,32], index: 4, kind: input, shape index: {}]   ;;  %s3928_s5 = inlined_call_operand.vmem [shape: f32[9,32], index: 5, kind: input, shape index: {}]   ;;  %s3929_s6 = inlined_call_operand.vmem [shape: f32[1,32], index: 6, kind: input, shape index: {}]   ;;  %s3930_s7 = inlined_call_operand.vmem [shape: f32[1,32], index: 7, kind: input, shape index: {}]   ;;  %s3931_s8 = inlined_call_operand.vmem [shape: bf16[8,32], index: 8, kind: input, shape index: {}]   ;;  %s3932_s9 = inlined_call_operand.vmem [shape: f32[8,1], index: 9, kind: input, shape index: {}]   ;;  %s3933_s10 = inlined_call_operand.vmem [shape: f32[8,1], index: 10, kind: input, shape index: {}]   ;;  %s3934_s11 = inlined_call_operand.hbm [shape: f32[2,8,256], index: 11, kind: output, shape index: {}]  }
   0x1   :  { %3938 = sst [smem:[#allocation8_spill]] %s3923_s0 }
   0x2   :  { %16 = vsyncpa [#allocation4], 0 }
   0x3   :  { %18 = vsyncpa [#allocation4 + $0x1], 0  ;;  %s2699_s17 = smov 0   ;;  %s2701_s18 = smov 0  }
   0x4   :  { %s2703_s19 = smov 0   ;;  %s2705_s20 = smov 0  }
   0x5 LB: > { %s2720_s21 = sadd.s32 4294967295, %s2634_s20   ;;  %s2290_s22 = sadd.s32 4294967294, %s2634_s20   ;;  %s2634_s20 = sphi %s2705_s20, %s3952_s20   ;;  %s2630_s19 = sphi %s2703_s19, %s3951_s19   ;;  %s2626_s18 = sphi %s2701_s18, %s3950_s18   ;;  %s2622_s17 = sphi %s2699_s17, %s3949_s17  }
   0x6   : > { %s2724_s23 = sadd.s32 1, %s2634_s20   ;;  %s272_s24 = sadd.s32 1, %s2630_s19 }
   0x7   : > { %s269_s25 = ssub.s32 %s2634_s20, %s2724_s23  ;;  %p282_p0 = scmp.ne.s32.totalorder %s2630_s19, %s2626_s18 }
   0x8   : > { %p270_p1 = scmp.eq.s32.totalorder %s269_s25, 0  ;;  %p283_p2 = scmp.eq.s32.totalorder %s2720_s21, 1 }
   0x9   : > { %p288_p3 = scmp.ne.s32.totalorder %s2626_s18, %s2622_s17  ;;  %p289_p4 = scmp.eq.s32.totalorder %s2290_s22, 1 }
   0xa   : > { %s2735_s26 = scalar_select %p270_p1, %s2630_s19, %s272_s24  }
   0xb   : > { %p2737_p5 = por %p283_p2, %p282_p0  ;;  %p2741_p6 = por %p289_p4, %p288_p3 }
   0xc   : > { %p2293_p7 = scmp.ge.s32.totalorder %s2634_s20, 1  ;;  %p350_p8 = scmp.lt.s32.totalorder %s2634_s20, 3 }
   0xe   : > { %p351_p9 = pnand %p2293_p7, %p350_p8 }
  0x10   : > { %354 = sbr.rel (%p351_p9) target bundleno = 707 (0x2c3), region = 64 }
  0x17   : > { %v438_v0 = vld [vmem:[%s3925_s2] sm:$0xf]  ;;  %vm568_vm0 = vcmask 1043456   ;;  %p395_p10 = scmp.lt.s32.totalorder %s2720_s21, 1  ;;  %s3941_s0 = sld [smem:[#allocation8_spill]]  ;;  %vm519_vm1 = vcmask 64512   ;;  %v998_v19 = vlaneseq }
  0x18   : > { %2510 = vmatprep.subr.msk.bf16.mxu0 %vm568_vm0, %v438_v0  ;;  %v570_v1 = vsel %vm568_vm0, %v438_v0, 0  ;;  %vm875_vm2 = vcmask 261120   ;;  %v2636_v18 = vmov 0.0   ;;  %vm878_vm3 = vcmask 254976   ;;  %v2851_v21 = vld [vmem:[%s3926_s3] ss:$0 sm:$0xff] }
  0x19   : > { %2429 = vmatpush3.bf16.msra.mxu0 %v570_v1  ;;  %s2752_s12 = scalar_select %p395_p10, %s2720_s21, 1  ;;  %883 = vst.msk [vmem:[#allocation2 + $0x30] sm:$0xff] %vm875_vm2, %v2636_v18  ;;  %884 = vst.msk [vmem:[#allocation2 + $0x38] sm:$0xff] %vm875_vm2, %v2636_v18  ;;  %v2846_v20 = vshrl.u32 %v998_v19, 7  ;;  %v2858_v25 = vld [vmem:[%s3927_s4] ss:$0 sm:$0xff] }
  0x1a   : > { %876 = vst.msk [vmem:[#allocation2] sm:$0xff] %vm875_vm2, %v2636_v18  ;;  %877 = vst.msk [vmem:[#allocation2 + $0x8] sm:$0xff] %vm875_vm2, %v2636_v18  ;;  %v2863_v26 = vld [vmem:[%s3928_s5] sm:$0xff]  ;;  %s392_s15 = sand.u32 1, %s2626_s18   ;;  %s2376_s29 = sshll.u32 %s2720_s21, 8 }
  0x1b   : > { %s2374_s13 = sshll.u32 %s2752_s12, 7  ;;  %880 = vst.msk [vmem:[#allocation2 + $0x18] sm:$0xff] %vm875_vm2, %v2636_v18  ;;  %881 = vst.msk [vmem:[#allocation2 + $0x20] sm:$0xff] %vm875_vm2, %v2636_v18  ;;  %v1000_v22 = vsub.s32 0, %v2846_v20  ;;  %v1100_v23 = vsub.s32 1, %v2846_v20  ;;  %v1200_v31 = vsub.s32 2, %v2846_v20 }
  0x1c   : > { %886 = vst.msk [vmem:[#allocation2 + $0x48] sm:$0xff] %vm875_vm2, %v2636_v18  ;;  %887 = vst.msk [vmem:[#allocation2 + $0x50] sm:$0xff] %vm875_vm2, %v2636_v18  ;;  %v1300_v48 = vsub.s32 3, %v2846_v20  ;;  %v1601_v62 = vsub.s32 6, %v2846_v20  ;;  %v1701_v63 = vsub.s32 7, %v2846_v20  ;;  %s2375_s14 = sshll.u32 %s2752_s12, 3 }
  0x1d   : > { %s2758_s16 = scalar_lea.vmem %s3941_s0, %s2374_s13  ;;  %889 = vst.msk [vmem:[#allocation2 + $0x60] sm:$0xff] %vm875_vm2, %v2636_v18  ;;  %890 = vst.msk [vmem:[#allocation2 + $0x68] sm:$0xff] %vm875_vm2, %v2636_v18  ;;  %v2871_v35 = vrot.slane %v2863_v26, %v1000_v22  ;;  %v2874_v36 = vrot.slane %v2863_v26, %v1100_v23  ;;  %v2881_v47 = vrot.slane %v2863_v26, %v1200_v31  ;;  %s404_s24 = scalar_lea.vmem %s3924_s1, %s2375_s14 }
  0x1e   : > { %v2553_v2 = vld [vmem:[%s2758_s16] sm:$0xff]   ;;  %v2554_v3 = vld [vmem:[%s2758_s16 + $0x8] sm:$0xff]   ;;  %v2555_v4 = vld [vmem:[%s2758_s16 + $0x10] sm:$0xff]   ;;  %892 = vst.msk [vmem:[#allocation2 + $0x78] sm:$0xff] %vm875_vm2, %v2636_v18  ;;  %v2913_v22 = vrot.slane %v2863_v26, %v1300_v48  ;;  %s2294_s25 = sshll.u32 %s392_s15, 4  ;;  %s2205_s22 = scalar_lea.sflag [#allocation4], %s392_s15 }
  0x1f   : > { %2430 = vmatprep.mubr.msk.bf16.mxu0 %vm519_vm1, %v2553_v2  ;;  %v2556_v5 = vld [vmem:[%s2758_s16 + $0x18] sm:$0xff]   ;;  %v2557_v6 = vld [vmem:[%s2758_s16 + $0x20] sm:$0xff]   ;;  %v2558_v7 = vld [vmem:[%s2758_s16 + $0x28] sm:$0xff]   ;;  %893 = vst.msk [vmem:[#allocation2 + $0x80] sm:$0xff] %vm875_vm2, %v2636_v18  ;;  %s394_s30 = scalar_lea.vmem [#allocation3], %s2294_s25  ;;  %s2638_s21 = smov [#allocation3]  }
  0x20   : > { %2431 = vmatmul.mubr.msk.bf16.vlgmr.msra.gmra.mrb[0].mxu0 %vm519_vm1, %v2554_v3  ;;  %v2559_v8 = vld [vmem:[%s2758_s16 + $0x30] sm:$0xff]   ;;  %v2560_v9 = vld [vmem:[%s2758_s16 + $0x38] sm:$0xff]   ;;  %v2561_v10 = vld [vmem:[%s2758_s16 + $0x40] sm:$0xff]   ;;  %895 = vst.msk [vmem:[#allocation2 + $0x90] sm:$0xff] %vm875_vm2, %v2636_v18  ;;  %s2219_s12 = sshll.u32 %s394_s30, 4  ;;  %s2576_s25 = sshll.u32 %s2638_s21, 4  ;;  %s3883_s12 = int_to_ptr.vmem [resolvable:$true] %s2219_s12  ;;  %s2577_s25 = int_to_ptr.vmem [resolvable:$false] %s2576_s25 }
  0x21   : > { %2434 = vmatprep.mubr.msk.bf16.mxu0 %vm519_vm1, %v2555_v4  ;;  %v2562_v11 = vld [vmem:[%s2758_s16 + $0x48] sm:$0xff]   ;;  %v2563_v12 = vld [vmem:[%s2758_s16 + $0x50] sm:$0xff]   ;;  %v2564_v13 = vld [vmem:[%s2758_s16 + $0x58] sm:$0xff]   ;;  %896 = vst.msk [vmem:[#allocation2 + $0x98] sm:$0xff] %vm875_vm2, %v2636_v18  ;;  %v1400_v4 = vsub.s32 4, %v2846_v20  ;;  %s2578_s0 = scalar_lea.vmem %s2577_s25, 512  ;;  %p2579_p0 = scmp.lt.s32.totalorder %s3883_s12, %s2577_s25 }
  0x22   : > { %v2565_v14 = vld [vmem:[%s2758_s16 + $0x60] sm:$0xff]   ;;  %v2566_v15 = vld [vmem:[%s2758_s16 + $0x68] sm:$0xff]   ;;  %v2567_v16 = vld [vmem:[%s2758_s16 + $0x70] sm:$0xff]   ;;  %898 = vst.msk [vmem:[#allocation2 + $0xa8] sm:$0xff] %vm875_vm2, %v2636_v18 }
  0x23   : > { %v2568_v17 = vld [vmem:[%s2758_s16 + $0x78] sm:$0xff]   ;;  %899 = vst.msk [vmem:[#allocation2 + $0xb0] sm:$0xff] %vm875_vm2, %v2636_v18  ;;  %901 = vst.msk [vmem:[#allocation2 + $0xc0] sm:$0xff] %vm875_vm2, %v2636_v18  ;;  %v966_v39 = vld [vmem:[#allocation2] sm:$0xff]  ;;  %v2916_v23 = vrot.slane %v2863_v26, %v1400_v4  ;;  %s3881_s16 = scalar_lea.hbm %s3934_s11, %s2376_s29 }
  0x24   : > { %902 = vst.msk [vmem:[#allocation2 + $0xc8] sm:$0xff] %vm875_vm2, %v2636_v18  ;;  %904 = vst.msk [vmem:[#allocation2 + $0xd8] sm:$0xff] %vm875_vm2, %v2636_v18  ;;  %v1066_v40 = vld [vmem:[#allocation2 + $0x1] sm:$0xff]  ;;  %v1002_v51 = vmul.f32 %v2871_v35, %v966_v39 }
  0x25   : > { %905 = vst.msk [vmem:[#allocation2 + $0xe0] sm:$0xff] %vm875_vm2, %v2636_v18  ;;  %907 = vst.msk [vmem:[#allocation2 + $0xf0] sm:$0xff] %vm875_vm2, %v2636_v18  ;;  %v967_v43 = vld [vmem:[#allocation2 + $0x8] sm:$0xff]  ;;  %v1102_v52 = vmul.f32 %v2874_v36, %v1066_v40 }
  0x26   : > { %908 = vst.msk [vmem:[#allocation2 + $0xf8] sm:$0xff] %vm875_vm2, %v2636_v18  ;;  %910 = vst.msk [vmem:[#allocation2 + $0x108] sm:$0xff] %vm875_vm2, %v2636_v18  ;;  %v1003_v56 = vmul.f32 %v2871_v35, %v967_v43  ;;  %v1166_v58 = vld [vmem:[#allocation2 + $0x2] sm:$0xff] }
  0x27   : > { %911 = vst.msk [vmem:[#allocation2 + $0x110] sm:$0xff] %vm875_vm2, %v2636_v18  ;;  %913 = vst.msk [vmem:[#allocation2 + $0x120] sm:$0xff] %vm875_vm2, %v2636_v18 }
  0x28   : > { %2435 = vmatmul.mubr.msk.bf16.gmra.mrb[4].mxu0 %vm519_vm1, %v2556_v5  ;;  %914 = vst.msk [vmem:[#allocation2 + $0x128] sm:$0xff] %vm875_vm2, %v2636_v18  ;;  %916 = vst.msk [vmem:[#allocation2 + $0x138] sm:$0xff] %vm875_vm2, %v2636_v18  ;;  %v1500_v5 = vsub.s32 5, %v2846_v20 }
  0x29   : > { %2438 = vmatprep.mubr.msk.bf16.mxu0 %vm519_vm1, %v2557_v6  ;;  %917 = vst.msk [vmem:[#allocation2 + $0x140] sm:$0xff] %vm875_vm2, %v2636_v18  ;;  %919 = vst.msk [vmem:[#allocation2 + $0x150] sm:$0xff] %vm875_vm2, %v2636_v18 }
  0x2a   : > { %920 = vst.msk [vmem:[#allocation2 + $0x158] sm:$0xff] %vm875_vm2, %v2636_v18  ;;  %922 = vst.msk [vmem:[#allocation2 + $0x168] sm:$0xff] %vm875_vm2, %v2636_v18 }
  0x2b   : > { %923 = vst.msk [vmem:[#allocation2 + $0x170] sm:$0xff] %vm875_vm2, %v2636_v18  ;;  %925 = vst.msk [vmem:[#allocation2 + $0x180] sm:$0xff] %vm875_vm2, %v2636_v18 }
  0x2c   : > { %926 = vst.msk [vmem:[#allocation2 + $0x188] sm:$0xff] %vm875_vm2, %v2636_v18  ;;  %928 = vst.msk [vmem:[#allocation2 + $0x198] sm:$0xff] %vm875_vm2, %v2636_v18 }
  0x2d   : > { %929 = vst.msk [vmem:[#allocation2 + $0x1a0] sm:$0xff] %vm875_vm2, %v2636_v18  ;;  %vm3202_vm4 = vmpackc.low %vm875_vm2, %vm875_vm2 }
  0x2e   : > { %885 = vst.msk [vmem:[#allocation2 + $0x40] sm:$0x3] %vm878_vm3, %v2636_v18  ;;  %879 = vst.msk [vmem:[#allocation2 + $0x10] sm:$0x3] %vm878_vm3, %v2636_v18 }
  0x2f   : > { %882 = vst.msk [vmem:[#allocation2 + $0x28] sm:$0x3] %vm878_vm3, %v2636_v18  ;;  %888 = vst.msk [vmem:[#allocation2 + $0x58] sm:$0x3] %vm878_vm3, %v2636_v18 }
  0x30   : > { %2439 = vmatmul.mubr.msk.bf16.gmra.mrb[8].mxu0 %vm519_vm1, %v2558_v7  ;;  %891 = vst.msk [vmem:[#allocation2 + $0x70] sm:$0x3] %vm878_vm3, %v2636_v18  ;;  %894 = vst.msk [vmem:[#allocation2 + $0x88] sm:$0x3] %vm878_vm3, %v2636_v18 }
  0x31   : > { %2442 = vmatprep.mubr.msk.bf16.mxu0 %vm519_vm1, %v2559_v8  ;;  %897 = vst.msk [vmem:[#allocation2 + $0xa0] sm:$0x3] %vm878_vm3, %v2636_v18  ;;  %900 = vst.msk [vmem:[#allocation2 + $0xb8] sm:$0x3] %vm878_vm3, %v2636_v18 }
  0x32   : > { %903 = vst.msk [vmem:[#allocation2 + $0xd0] sm:$0x3] %vm878_vm3, %v2636_v18  ;;  %906 = vst.msk [vmem:[#allocation2 + $0xe8] sm:$0x3] %vm878_vm3, %v2636_v18 }
  0x33   : > { %909 = vst.msk [vmem:[#allocation2 + $0x100] sm:$0x3] %vm878_vm3, %v2636_v18  ;;  %912 = vst.msk [vmem:[#allocation2 + $0x118] sm:$0x3] %vm878_vm3, %v2636_v18 }
  0x34   : > { %915 = vst.msk [vmem:[#allocation2 + $0x130] sm:$0x3] %vm878_vm3, %v2636_v18  ;;  %918 = vst.msk [vmem:[#allocation2 + $0x148] sm:$0x3] %vm878_vm3, %v2636_v18 }
  0x35   : > { %921 = vst.msk [vmem:[#allocation2 + $0x160] sm:$0x3] %vm878_vm3, %v2636_v18  ;;  %924 = vst.msk [vmem:[#allocation2 + $0x178] sm:$0x3] %vm878_vm3, %v2636_v18  ;;  %v1067_v44 = vld [vmem:[#allocation2 + $0x9] sm:$0xff] }
  0x36   : > { %927 = vst.msk [vmem:[#allocation2 + $0x190] sm:$0x3] %vm878_vm3, %v2636_v18  ;;  %930 = vst.msk [vmem:[#allocation2 + $0x1a8] sm:$0x3] %vm878_vm3, %v2636_v18  ;;  %v1103_v57 = vmul.f32 %v2874_v36, %v1067_v44  ;;  %v1167_v0 = vld [vmem:[#allocation2 + $0xa] sm:$0xff]  ;;  %v2909_v18 = vrot.slane %v2863_v26, %v1701_v63 }
  0x38   : > { %2443 = vmatmul.mubr.msk.bf16.gmra.mrb[12].mxu0 %vm519_vm1, %v2560_v9  ;;  %v1134_v9 = vadd.f32 %v1102_v52, %v1002_v51 }
  0x39   : > { %2446 = vmatprep.mubr.msk.bf16.mxu0 %vm519_vm1, %v2561_v10  ;;  %v1202_v10 = vmul.f32 %v2881_v47, %v1166_v58 }
  0x40   : > { %2447 = vmatmul.mubr.msk.bf16.gmra.mrb[16].mxu0 %vm519_vm1, %v2562_v11 }
  0x41   : > { %2450 = vmatprep.mubr.msk.bf16.mxu0 %vm519_vm1, %v2563_v12 }
  0x48   : > { %2451 = vmatmul.mubr.msk.bf16.gmra.mrb[20].mxu0 %vm519_vm1, %v2564_v13  ;;  %v1135_v13 = vadd.f32 %v1103_v57, %v1003_v56 }
  0x49   : > { %2454 = vmatprep.mubr.msk.bf16.mxu0 %vm519_vm1, %v2565_v14  ;;  %v1203_v14 = vmul.f32 %v2881_v47, %v1167_v0 }
  0x50   : > { %2455 = vmatmul.mubr.msk.bf16.gmra.mrb[24].mxu0 %vm519_vm1, %v2566_v15 }
  0x51   : > { %2458 = vmatprep.mubr.msk.bf16.mxu0 %vm519_vm1, %v2567_v16 }
  0x58   : > { %2459 = vmatmul.mubr.msk.bf16.gmra.mrb[28].mxu0 %vm519_vm1, %v2568_v17  ;;  %v2906_v17 = vrot.slane %v2863_v26, %v1601_v62  ;;  %v2959_v62 = vld [vmem:[%s3928_s5 + $0x8] ss:$0 sm:$0xff] }
  0xf3   : > { %v2432_v24 = vpop.f32.mrb[0].mxu0 }
  0xf4   : > { %v742_v27 = vmul.f32 %v2432_v24, %v2851_v21  ;;  %v606_v28 = vpop.f32.mrb[1].mxu0 }
  0xf5   : > { %v740_v29 = vmul.f32 %v2851_v21, %v606_v28  ;;  %v2433_v30 = vpop.f32.mrb[2].mxu0  ;;  %v2919_v28 = vrot.slane %v2863_v26, %v1500_v5 }
  0xf6   : > { %v781_v32 = vadd.f32 %v2858_v25, %v742_v27  ;;  %v743_v33 = vmul.f32 %v2433_v30, %v2851_v21  ;;  %v609_v34 = vpop.f32.mrb[3].mxu0 }
  0xf7   : > { %v779_v37 = vadd.f32 %v2858_v25, %v740_v29  ;;  %v741_v38 = vmul.f32 %v2851_v21, %v609_v34 }
  0xf8   : > { %v813_v41 = vmax.f32 %v781_v32, 0.0  ;;  %v782_v42 = vadd.f32 %v2858_v25, %v743_v33  ;;  %v1234_v32 = vadd.f32 %v1202_v10, %v1134_v9  ;;  %v1235_v33 = vadd.f32 %v1203_v14, %v1135_v13 }
  0xf9   : > { %v811_v45 = vmax.f32 %v779_v37, 0.0  ;;  %v780_v46 = vadd.f32 %v2858_v25, %v741_v38 }
  0xfa   : > { %v845_v49 = vmin.f32 %v813_v41, 6.0  ;;  %v814_v50 = vmax.f32 %v782_v42, 0.0 }
  0xfb   : > { %v843_v53 = vmin.f32 %v811_v45, 6.0  ;;  %v812_v54 = vmax.f32 %v780_v46, 0.0  ;;  %v2436_v55 = vpop.f32.mrb[4].mxu0 }
  0xfc   : > { %934 = vst.msk [vmem:[#allocation2 + $0x31] sm:$0xff] %vm875_vm2, %v845_v49  ;;  %v846_v59 = vmin.f32 %v814_v50, 6.0  ;;  %v746_v60 = vmul.f32 %v2436_v55, %v2851_v21  ;;  %v622_v61 = vpop.f32.mrb[5].mxu0 }
  0xfd   : > { %932 = vst.msk [vmem:[#allocation2 + $0x19] sm:$0xff] %vm875_vm2, %v843_v53  ;;  %v844_v1 = vmin.f32 %v812_v54, 6.0  ;;  %v744_v2 = vmul.f32 %v2851_v21, %v622_v61  ;;  %v2437_v3 = vpop.f32.mrb[6].mxu0 }
  0xfe   : > { %935 = vst.msk [vmem:[#allocation2 + $0x39] sm:$0xff] %vm875_vm2, %v846_v59  ;;  %v785_v6 = vadd.f32 %v2858_v25, %v746_v60  ;;  %v747_v7 = vmul.f32 %v2437_v3, %v2851_v21  ;;  %v625_v8 = vpop.f32.mrb[7].mxu0 }
  0xff   : > { %933 = vst.msk [vmem:[#allocation2 + $0x21] sm:$0xff] %vm875_vm2, %v844_v1  ;;  %v783_v11 = vadd.f32 %v2858_v25, %v744_v2  ;;  %v745_v12 = vmul.f32 %v2851_v21, %v625_v8 }
 0x100   : > { %v817_v15 = vmax.f32 %v785_v6, 0.0  ;;  %v786_v16 = vadd.f32 %v2858_v25, %v747_v7 }
 0x101   : > { %v815_v19 = vmax.f32 %v783_v11, 0.0  ;;  %v784_v20 = vadd.f32 %v2858_v25, %v745_v12 }
 0x102   : > { %v849_v24 = vmin.f32 %v817_v15, 6.0  ;;  %v818_v27 = vmax.f32 %v786_v16, 0.0 }
 0x103   : > { %v847_v29 = vmin.f32 %v815_v19, 6.0  ;;  %v816_v30 = vmax.f32 %v784_v20, 0.0  ;;  %v2440_v31 = vpop.f32.mrb[8].mxu0  ;;  %v2921_v34 = vld [vmem:[#allocation2 + $0x30] sm:$0xff] }
 0x104   : > { %v2923_v37 = vld [vmem:[#allocation2 + $0x31] sm:$0xff]  ;;  %938 = vst.msk [vmem:[#allocation2 + $0x61] sm:$0xff] %vm875_vm2, %v849_v24  ;;  %v850_v38 = vmin.f32 %v818_v27, 6.0  ;;  %v750_v39 = vmul.f32 %v2440_v31, %v2851_v21  ;;  %v638_v40 = vpop.f32.mrb[9].mxu0  ;;  %v2927_v42 = vld [vmem:[#allocation2 + $0x19] sm:$0xff]  ;;  %v1603_v26 = vmul.f32 %v2906_v17, %v2921_v34 }
 0x105   : > { %v1266_v41 = vld [vmem:[#allocation2 + $0x18] sm:$0xff]  ;;  %v2933_v43 = vmul.f32 %v2909_v18, %v2923_v37  ;;  %936 = vst.msk [vmem:[#allocation2 + $0x49] sm:$0xff] %vm875_vm2, %v847_v29  ;;  %v848_v44 = vmin.f32 %v816_v30, 6.0  ;;  %v748_v45 = vmul.f32 %v2851_v21, %v638_v40  ;;  %v2441_v46 = vpop.f32.mrb[10].mxu0  ;;  %v1402_v49 = vmul.f32 %v2916_v23, %v2927_v42 }
 0x106   : > { %v1302_v48 = vmul.f32 %v2913_v22, %v1266_v41  ;;  %v2940_v50 = vld [vmem:[#allocation2 + $0x38] sm:$0xff]  ;;  %939 = vst.msk [vmem:[#allocation2 + $0x69] sm:$0xff] %vm875_vm2, %v850_v38  ;;  %v789_v52 = vadd.f32 %v2858_v25, %v750_v39  ;;  %v751_v53 = vmul.f32 %v2441_v46, %v2851_v21  ;;  %v641_v54 = vpop.f32.mrb[11].mxu0  ;;  %v1267_v55 = vld [vmem:[#allocation2 + $0x20] sm:$0xff] }
 0x107   : > { %v2942_v51 = vld [vmem:[#allocation2 + $0x39] sm:$0xff]  ;;  %v1367_v56 = vld [vmem:[#allocation2 + $0x21] sm:$0xff]  ;;  %v1604_v58 = vmul.f32 %v2906_v17, %v2940_v50  ;;  %937 = vst.msk [vmem:[#allocation2 + $0x51] sm:$0xff] %vm875_vm2, %v848_v44  ;;  %v787_v60 = vadd.f32 %v2858_v25, %v748_v45  ;;  %v749_v61 = vmul.f32 %v2851_v21, %v641_v54  ;;  %v1303_v63 = vmul.f32 %v2913_v22, %v1267_v55 }
 0x108   : > { %v2947_v57 = vld [vmem:[#allocation2 + $0x1a] sm:$0xff]  ;;  %v1704_v59 = vmul.f32 %v2909_v18, %v2942_v51  ;;  %v1334_v0 = vadd.f32 %v1302_v48, %v1234_v32  ;;  %v2962_v1 = vld [vmem:[#allocation2 + $0x22] sm:$0xff]  ;;  %v2964_v2 = vld [vmem:[#allocation2 + $0x32] sm:$0xff]  ;;  %v821_v3 = vmax.f32 %v789_v52, 0.0  ;;  %v790_v4 = vadd.f32 %v2858_v25, %v751_v53 }
 0x109   : > { %v1403_v5 = vmul.f32 %v2916_v23, %v1367_v56  ;;  %v1502_v6 = vmul.f32 %v2919_v28, %v2947_v57  ;;  %v819_v7 = vmax.f32 %v787_v60, 0.0  ;;  %v788_v8 = vadd.f32 %v2858_v25, %v749_v61  ;;  %v2971_v11 = vld [vmem:[#allocation2 + $0x3a] sm:$0xff] }
 0x10a   : > { %v1335_v9 = vadd.f32 %v1303_v63, %v1235_v33  ;;  %v1434_v10 = vadd.f32 %v1402_v49, %v1334_v0  ;;  %3942 = vst [vmem:[#allocation6_spill] sm:$0xff] %v2971_v11  ;;  %v853_v12 = vmin.f32 %v821_v3, 6.0  ;;  %v822_v13 = vmax.f32 %v790_v4, 0.0  ;;  %v2998_v0 = vld [vmem:[%s3929_s6] ss:$0 sm:$0xff] }
 0x10b   : > { %v1503_v14 = vmul.f32 %v2919_v28, %v2962_v1  ;;  %v1803_v15 = vmul.f32 %v2959_v62, %v2964_v2  ;;  %v851_v16 = vmin.f32 %v819_v7, 6.0  ;;  %v820_v19 = vmax.f32 %v788_v8, 0.0  ;;  %v2444_v20 = vpop.f32.mrb[12].mxu0 }
 0x10c   : > { %v1435_v24 = vadd.f32 %v1403_v5, %v1335_v9  ;;  %v1534_v27 = vadd.f32 %v1502_v6, %v1434_v10  ;;  %942 = vst.msk [vmem:[#allocation2 + $0x91] sm:$0xff] %vm875_vm2, %v853_v12  ;;  %v854_v29 = vmin.f32 %v822_v13, 6.0  ;;  %v754_v30 = vmul.f32 %v2444_v20, %v2851_v21  ;;  %v654_v31 = vpop.f32.mrb[13].mxu0 }
 0x10d   : > { %v1804_v32 = vmul.f32 %v2959_v62, %v2971_v11  ;;  %v1004_v33 = vmul.f32 %v1266_v41, %v2871_v35  ;;  %940 = vst.msk [vmem:[#allocation2 + $0x79] sm:$0xff] %vm875_vm2, %v851_v16  ;;  %v852_v38 = vmin.f32 %v820_v19, 6.0  ;;  %v752_v39 = vmul.f32 %v2851_v21, %v654_v31  ;;  %v2445_v40 = vpop.f32.mrb[14].mxu0 }
 0x10e   : > { %v1535_v44 = vadd.f32 %v1503_v14, %v1435_v24  ;;  %v1635_v45 = vadd.f32 %v1603_v26, %v1534_v27  ;;  %943 = vst.msk [vmem:[#allocation2 + $0x99] sm:$0xff] %vm875_vm2, %v854_v29  ;;  %v793_v46 = vadd.f32 %v2858_v25, %v754_v30  ;;  %v755_v48 = vmul.f32 %v2445_v40, %v2851_v21  ;;  %v657_v49 = vpop.f32.mrb[15].mxu0 }
 0x10f   : > { %v1005_v52 = vmul.f32 %v1267_v55, %v2871_v35  ;;  %v1104_v41 = vmul.f32 %v2927_v42, %v2874_v36  ;;  %941 = vst.msk [vmem:[#allocation2 + $0x81] sm:$0xff] %vm875_vm2, %v852_v38  ;;  %v791_v53 = vadd.f32 %v2858_v25, %v752_v39  ;;  %v753_v54 = vmul.f32 %v2851_v21, %v657_v49 }
 0x110   : > { %v1636_v60 = vadd.f32 %v1604_v58, %v1535_v44  ;;  %v1735_v26 = vadd.f32 %v2933_v43, %v1635_v45  ;;  %v825_v61 = vmax.f32 %v793_v46, 0.0  ;;  %v794_v63 = vadd.f32 %v2858_v25, %v755_v48  ;;  %v3005_v43 = vld [vmem:[%s3930_s7] ss:$0 sm:$0xff] }
 0x111   : > { %v1105_v55 = vmul.f32 %v1367_v56, %v2874_v36  ;;  %v1136_v42 = vadd.f32 %v1104_v41, %v1004_v33  ;;  %v823_v3 = vmax.f32 %v791_v53, 0.0  ;;  %v792_v4 = vadd.f32 %v2858_v25, %v753_v54 }
 0x112   : > { %v1736_v5 = vadd.f32 %v1704_v59, %v1636_v60  ;;  %v1835_v6 = vadd.f32 %v1803_v15, %v1735_v26  ;;  %v857_v7 = vmin.f32 %v825_v61, 6.0  ;;  %v826_v58 = vmax.f32 %v794_v63, 0.0 }
 0x113   : > { %v1137_v8 = vadd.f32 %v1105_v55, %v1005_v52  ;;  %v1204_v9 = vmul.f32 %v2947_v57, %v2881_v47  ;;  %v855_v10 = vmin.f32 %v823_v3, 6.0  ;;  %v824_v12 = vmax.f32 %v792_v4, 0.0  ;;  %v2448_v56 = vpop.f32.mrb[16].mxu0 }
 0x114   : > { %v1836_v13 = vadd.f32 %v1804_v32, %v1736_v5  ;;  %v1874_v14 = vmul.f32 %v2998_v0, %v1835_v6  ;;  %946 = vst.msk [vmem:[#allocation2 + $0xc1] sm:$0xff] %vm875_vm2, %v857_v7  ;;  %v858_v59 = vmin.f32 %v826_v58, 6.0  ;;  %v758_v15 = vmul.f32 %v2448_v56, %v2851_v21  ;;  %v670_v16 = vpop.f32.mrb[17].mxu0 }
 0x115   : > { %v1205_v19 = vmul.f32 %v2962_v1, %v2881_v47  ;;  %v1236_v20 = vadd.f32 %v1204_v9, %v1136_v42  ;;  %944 = vst.msk [vmem:[#allocation2 + $0xa9] sm:$0xff] %vm875_vm2, %v855_v10  ;;  %v856_v24 = vmin.f32 %v824_v12, 6.0  ;;  %v756_v57 = vmul.f32 %v2851_v21, %v670_v16  ;;  %v2449_v27 = vpop.f32.mrb[18].mxu0 }
 0x116   : > { %v1875_v29 = vmul.f32 %v2998_v0, %v1836_v13  ;;  %v1913_v30 = vadd.f32 %v3005_v43, %v1874_v14  ;;  %947 = vst.msk [vmem:[#allocation2 + $0xc9] sm:$0xff] %vm875_vm2, %v858_v59  ;;  %v797_v31 = vadd.f32 %v2858_v25, %v758_v15  ;;  %v759_v32 = vmul.f32 %v2449_v27, %v2851_v21  ;;  %v673_v33 = vpop.f32.mrb[19].mxu0 }
 0x117   : > { %v1237_v38 = vadd.f32 %v1205_v19, %v1137_v8  ;;  %v1304_v1 = vmul.f32 %v2921_v34, %v2913_v22  ;;  %945 = vst.msk [vmem:[#allocation2 + $0xb1] sm:$0xff] %vm875_vm2, %v856_v24  ;;  %v795_v39 = vadd.f32 %v2858_v25, %v756_v57  ;;  %v757_v40 = vmul.f32 %v2851_v21, %v673_v33 }
 0x118   : > { %v1914_v44 = vadd.f32 %v3005_v43, %v1875_v29  ;;  %v1945_v45 = vmax.f32 %v1913_v30, 0.0  ;;  %v829_v46 = vmax.f32 %v797_v31, 0.0  ;;  %v798_v48 = vadd.f32 %v2858_v25, %v759_v32 }
 0x119   : > { %v1305_v49 = vmul.f32 %v2940_v50, %v2913_v22  ;;  %v1336_v52 = vadd.f32 %v1304_v1, %v1236_v20  ;;  %v827_v41 = vmax.f32 %v795_v39, 0.0  ;;  %v796_v53 = vadd.f32 %v2858_v25, %v757_v40 }
 0x11a   : > { %v1946_v54 = vmax.f32 %v1914_v44, 0.0  ;;  %v3031_v60 = vmin.f32 %v1945_v45, 6.0  ;;  %v861_v26 = vmin.f32 %v829_v46, 6.0  ;;  %v830_v61 = vmax.f32 %v798_v48, 0.0  ;;  %v3060_v48 = vld [vmem:[#allocation2 + $0x48] sm:$0xff] }
 0x11b   : > { %v1337_v63 = vadd.f32 %v1305_v49, %v1237_v38  ;;  %v1404_v55 = vmul.f32 %v2923_v37, %v2916_v23  ;;  %v859_v42 = vmin.f32 %v827_v41, 6.0  ;;  %v828_v3 = vmax.f32 %v796_v53, 0.0  ;;  %v2452_v4 = vpop.f32.mrb[20].mxu0  ;;  %v982_v5 = vld [vmem:[#allocation2 + $0xc0] sm:$0xff]  ;;  %3943 = vst [vmem:[#allocation7_spill] sm:$0xff] %v3060_v48 }
 0x11c   : > { %v1082_v6 = vld [vmem:[#allocation2 + $0xc1] sm:$0xff]  ;;  %v3035_v7 = vmin.f32 %v1946_v54, 6.0  ;;  %v1405_v58 = vmul.f32 %v2942_v51, %v2916_v23  ;;  %950 = vst.msk [vmem:[#allocation2 + $0xf1] sm:$0xff] %vm875_vm2, %v861_v26  ;;  %v862_v8 = vmin.f32 %v830_v61, 6.0  ;;  %v762_v9 = vmul.f32 %v2452_v4, %v2851_v21  ;;  %v686_v10 = vpop.f32.mrb[21].mxu0 }
 0x11d   : > { %v1018_v12 = vmul.f32 %v2871_v35, %v982_v5  ;;  %v1118_v56 = vmul.f32 %v2874_v36, %v1082_v6  ;;  %948 = vst.msk [vmem:[#allocation2 + $0xd9] sm:$0xff] %vm875_vm2, %v859_v42  ;;  %v860_v13 = vmin.f32 %v828_v3, 6.0  ;;  %v760_v14 = vmul.f32 %v2851_v21, %v686_v10  ;;  %v2453_v59 = vpop.f32.mrb[22].mxu0  ;;  %v983_v15 = vld [vmem:[#allocation2 + $0xc8] sm:$0xff] }
 0x11e   : > { %v1083_v16 = vld [vmem:[#allocation2 + $0xc9] sm:$0xff]  ;;  %v3047_v24 = vadd.f32 %v1404_v55, %v1336_v52  ;;  %951 = vst.msk [vmem:[#allocation2 + $0xf9] sm:$0xff] %vm875_vm2, %v862_v8  ;;  %v801_v57 = vadd.f32 %v2858_v25, %v762_v9  ;;  %v763_v27 = vmul.f32 %v2453_v59, %v2851_v21  ;;  %v689_v29 = vpop.f32.mrb[23].mxu0  ;;  %v1019_v30 = vmul.f32 %v2871_v35, %v983_v15 }
 0x11f   : > { %v1182_v19 = vld [vmem:[#allocation2 + $0xc2] sm:$0xff]  ;;  %v1119_v31 = vmul.f32 %v2874_v36, %v1083_v16  ;;  %v1183_v32 = vld [vmem:[#allocation2 + $0xca] sm:$0xff]  ;;  %949 = vst.msk [vmem:[#allocation2 + $0xe1] sm:$0xff] %vm875_vm2, %v860_v13  ;;  %v799_v33 = vadd.f32 %v2858_v25, %v760_v14  ;;  %v761_v38 = vmul.f32 %v2851_v21, %v689_v29  ;;  %v1150_v1 = vadd.f32 %v1118_v56, %v1018_v12 }
 0x120   : > { %v1218_v39 = vmul.f32 %v2881_v47, %v1182_v19  ;;  %v833_v40 = vmax.f32 %v801_v57, 0.0  ;;  %v802_v44 = vadd.f32 %v2858_v25, %v763_v27  ;;  %v1219_v46 = vmul.f32 %v2881_v47, %v1183_v32 }
 0x121   : > { %v1151_v45 = vadd.f32 %v1119_v31, %v1019_v30  ;;  %v831_v49 = vmax.f32 %v799_v33, 0.0  ;;  %v800_v52 = vadd.f32 %v2858_v25, %v761_v38  ;;  %v3063_v53 = vadd.f32 %v1405_v58, %v1337_v63 }
 0x122   : > { %v1250_v41 = vadd.f32 %v1218_v39, %v1150_v1  ;;  %v865_v54 = vmin.f32 %v833_v40, 6.0  ;;  %v834_v26 = vmax.f32 %v802_v44, 0.0  ;;  %v3067_v55 = vmul.f32 %v2964_v2, %v2919_v28 }
 0x123   : > { %v1251_v61 = vadd.f32 %v1219_v46, %v1151_v45  ;;  %v863_v42 = vmin.f32 %v831_v49, 6.0  ;;  %v832_v3 = vmax.f32 %v800_v52, 0.0  ;;  %v2456_v4 = vpop.f32.mrb[24].mxu0  ;;  %v3069_v5 = vld [vmem:[#allocation2 + $0xf0] sm:$0xff]  ;;  %v3075_v8 = vmul.f32 %v2971_v11, %v2919_v28 }
 0x124   : > { %v3071_v6 = vld [vmem:[#allocation2 + $0xf1] sm:$0xff]  ;;  %v3079_v63 = vmul.f32 %v2906_v17, %v3060_v48  ;;  %954 = vst.msk [vmem:[#allocation2 + $0x121] sm:$0xff] %vm875_vm2, %v865_v54  ;;  %v866_v58 = vmin.f32 %v834_v26, 6.0  ;;  %v766_v9 = vmul.f32 %v2456_v4, %v2851_v21  ;;  %v702_v10 = vpop.f32.mrb[25].mxu0  ;;  %v1382_v56 = vld [vmem:[#allocation2 + $0xd9] sm:$0xff]  ;;  %v1619_v13 = vmul.f32 %v2906_v17, %v3069_v5 }
 0x125   : > { %v1282_v12 = vld [vmem:[#allocation2 + $0xd8] sm:$0xff]  ;;  %v3087_v14 = vmul.f32 %v2909_v18, %v3071_v6  ;;  %952 = vst.msk [vmem:[#allocation2 + $0x109] sm:$0xff] %vm875_vm2, %v863_v42  ;;  %v864_v59 = vmin.f32 %v832_v3, 6.0  ;;  %v764_v15 = vmul.f32 %v2851_v21, %v702_v10  ;;  %v2457_v16 = vpop.f32.mrb[26].mxu0  ;;  %v1418_v57 = vmul.f32 %v2916_v23, %v1382_v56 }
 0x126   : > { %v1318_v19 = vmul.f32 %v2913_v22, %v1282_v12  ;;  %v3093_v27 = vld [vmem:[#allocation2 + $0xf8] sm:$0xff]  ;;  %955 = vst.msk [vmem:[#allocation2 + $0x129] sm:$0xff] %vm875_vm2, %v866_v58  ;;  %v805_v30 = vadd.f32 %v2858_v25, %v766_v9  ;;  %v767_v31 = vmul.f32 %v2457_v16, %v2851_v21  ;;  %v705_v32 = vpop.f32.mrb[27].mxu0  ;;  %v1283_v33 = vld [vmem:[#allocation2 + $0xe0] sm:$0xff] }
 0x127   : > { %v3095_v29 = vld [vmem:[#allocation2 + $0xf9] sm:$0xff]  ;;  %v1383_v38 = vld [vmem:[#allocation2 + $0xe1] sm:$0xff]  ;;  %v1620_v39 = vmul.f32 %v2906_v17, %v3093_v27  ;;  %953 = vst.msk [vmem:[#allocation2 + $0x111] sm:$0xff] %vm875_vm2, %v864_v59  ;;  %v803_v44 = vadd.f32 %v2858_v25, %v764_v15  ;;  %v765_v45 = vmul.f32 %v2851_v21, %v705_v32  ;;  %v1319_v46 = vmul.f32 %v2913_v22, %v1283_v33 }
 0x128   : > { %v1482_v1 = vld [vmem:[#allocation2 + $0xda] sm:$0xff]  ;;  %v1720_v40 = vmul.f32 %v2909_v18, %v3095_v29  ;;  %v1350_v49 = vadd.f32 %v1318_v19, %v1250_v41  ;;  %v1483_v52 = vld [vmem:[#allocation2 + $0xe2] sm:$0xff]  ;;  %v3108_v54 = vld [vmem:[#allocation2 + $0xf2] sm:$0xff]  ;;  %v837_v26 = vmax.f32 %v805_v30, 0.0  ;;  %v806_v42 = vadd.f32 %v2858_v25, %v767_v31 }
 0x129   : > { %v1419_v3 = vmul.f32 %v2916_v23, %v1383_v38  ;;  %v1518_v4 = vmul.f32 %v2919_v28, %v1482_v1  ;;  %v835_v58 = vmax.f32 %v803_v44, 0.0  ;;  %v804_v9 = vadd.f32 %v2858_v25, %v765_v45  ;;  %v3114_v15 = vld [vmem:[#allocation2 + $0xfa] sm:$0xff] }
 0x12a   : > { %v1351_v10 = vadd.f32 %v1319_v46, %v1251_v61  ;;  %v1450_v59 = vadd.f32 %v1418_v57, %v1350_v49  ;;  %v869_v16 = vmin.f32 %v837_v26, 6.0  ;;  %v838_v32 = vmax.f32 %v806_v42, 0.0 }
 0x12b   : > { %v1519_v41 = vmul.f32 %v2919_v28, %v1483_v52  ;;  %v1819_v19 = vmul.f32 %v2959_v62, %v3108_v54  ;;  %v867_v30 = vmin.f32 %v835_v58, 6.0  ;;  %v836_v31 = vmax.f32 %v804_v9, 0.0  ;;  %v2460_v20 = vpop.f32.mrb[28].mxu0 }
 0x12c   : > { %v1451_v48 = vadd.f32 %v1419_v3, %v1351_v10  ;;  %v1550_v11 = vadd.f32 %v1518_v4, %v1450_v59  ;;  %958 = vst.msk [vmem:[#allocation2 + $0x151] sm:$0xff] %vm875_vm2, %v869_v16  ;;  %v870_v44 = vmin.f32 %v838_v32, 6.0  ;;  %v770_v61 = vmul.f32 %v2460_v20, %v2851_v21  ;;  %v718_v57 = vpop.f32.mrb[29].mxu0 }
 0x12d   : > { %v1820_v45 = vmul.f32 %v2959_v62, %v3114_v15  ;;  %v1020_v46 = vmul.f32 %v1282_v12, %v2871_v35  ;;  %956 = vst.msk [vmem:[#allocation2 + $0x139] sm:$0xff] %vm875_vm2, %v867_v30  ;;  %v868_v49 = vmin.f32 %v836_v31, 6.0  ;;  %v768_v26 = vmul.f32 %v2851_v21, %v718_v57  ;;  %v2461_v42 = vpop.f32.mrb[30].mxu0 }
 0x12e   : > { %v1551_v58 = vadd.f32 %v1519_v41, %v1451_v48  ;;  %v1651_v3 = vadd.f32 %v1619_v13, %v1550_v11  ;;  %959 = vst.msk [vmem:[#allocation2 + $0x159] sm:$0xff] %vm875_vm2, %v870_v44  ;;  %v809_v4 = vadd.f32 %v2858_v25, %v770_v61  ;;  %v771_v20 = vmul.f32 %v2461_v42, %v2851_v21  ;;  %v721_v9 = vpop.f32.mrb[31].mxu0 }
 0x12f   : > { %v1021_v10 = vmul.f32 %v1283_v33, %v2871_v35  ;;  %v1120_v59 = vmul.f32 %v1382_v56, %v2874_v36  ;;  %957 = vst.msk [vmem:[#allocation2 + $0x141] sm:$0xff] %vm875_vm2, %v868_v49  ;;  %v807_v12 = vadd.f32 %v2858_v25, %v768_v26  ;;  %v769_v16 = vmul.f32 %v2851_v21, %v721_v9 }
 0x130   : > { %v1652_v32 = vadd.f32 %v1620_v39, %v1551_v58  ;;  %v1751_v11 = vadd.f32 %v3087_v14, %v1651_v3  ;;  %v841_v48 = vmax.f32 %v809_v4, 0.0  ;;  %v810_v13 = vadd.f32 %v2858_v25, %v771_v20 }
 0x131   : > { %v1121_v41 = vmul.f32 %v1383_v38, %v2874_v36  ;;  %v1152_v30 = vadd.f32 %v1120_v59, %v1020_v46  ;;  %v839_v31 = vmax.f32 %v807_v12, 0.0  ;;  %v808_v33 = vadd.f32 %v2858_v25, %v769_v16  ;;  %v3160_v16 = vld [vmem:[#allocation2 + $0x108] sm:$0xff] }
 0x132   : > { %v1752_v44 = vadd.f32 %v1720_v40, %v1652_v32  ;;  %v1851_v56 = vadd.f32 %v1819_v19, %v1751_v11  ;;  %v873_v61 = vmin.f32 %v841_v48, 6.0  ;;  %v842_v57 = vmax.f32 %v810_v13, 0.0  ;;  %v3162_v32 = vld [vmem:[#allocation2 + $0x110] sm:$0xff] }
 0x133   : > { %v1153_v49 = vadd.f32 %v1121_v41, %v1021_v10  ;;  %v1220_v26 = vmul.f32 %v1482_v1, %v2881_v47  ;;  %v871_v21 = vmin.f32 %v839_v31, 6.0  ;;  %v840_v39 = vmax.f32 %v808_v33, 0.0  ;;  %v3164_v11 = vld [vmem:[#allocation2 + $0x112] sm:$0xff]  ;;  %v3170_v31 = vld [vmem:[#allocation2 + $0x109] sm:$0xff] }
 0x134   : > { %v1852_v42 = vadd.f32 %v1820_v45, %v1752_v44  ;;  %v1890_v14 = vmul.f32 %v2998_v0, %v1851_v56  ;;  %962 = vst.msk [vmem:[#allocation2 + $0x181] sm:$0xff] %vm875_vm2, %v873_v61  ;;  %v874_v58 = vmin.f32 %v842_v57, 6.0  ;;  %v1221_v38 = vmul.f32 %v1483_v52, %v2881_v47  ;;  %v3172_v33 = vld [vmem:[#allocation2 + $0x111] sm:$0xff] }
 0x135   : > { %v1252_v46 = vadd.f32 %v1220_v26, %v1152_v30  ;;  %v1320_v25 = vmul.f32 %v3069_v5, %v2913_v22  ;;  %960 = vst.msk [vmem:[#allocation2 + $0x169] sm:$0xff] %vm875_vm2, %v871_v21  ;;  %v872_v40 = vmin.f32 %v840_v39, 6.0  ;;  %v1321_v45 = vmul.f32 %v3093_v27, %v2913_v22  ;;  %v3174_v44 = vld [vmem:[#allocation2 + $0x50] sm:$0xff] }
 0x136   : > { %v1891_v19 = vmul.f32 %v2998_v0, %v1852_v42  ;;  %v1929_v1 = vadd.f32 %v3005_v43, %v1890_v14  ;;  %963 = vst.msk [vmem:[#allocation2 + $0x189] sm:$0xff] %vm875_vm2, %v874_v58  ;;  %v1253_v3 = vadd.f32 %v1221_v38, %v1153_v49  ;;  %v1420_v52 = vmul.f32 %v3071_v6, %v2916_v23  ;;  %v3180_v26 = vld [vmem:[#allocation2 + $0x10a] sm:$0xff] }
 0x137   : > { %v1352_v4 = vadd.f32 %v1320_v25, %v1252_v46  ;;  %v1421_v20 = vmul.f32 %v3095_v29, %v2916_v23  ;;  %961 = vst.msk [vmem:[#allocation2 + $0x171] sm:$0xff] %vm875_vm2, %v872_v40  ;;  %v1520_v59 = vmul.f32 %v3108_v54, %v2919_v28  ;;  %v1521_v12 = vmul.f32 %v3114_v15, %v2919_v28  ;;  %v3182_v21 = vld [vmem:[#allocation2 + $0x49] sm:$0xff]  ;;  %v3184_v39 = vld [vmem:[#allocation2 + $0x51] sm:$0xff] }
 0x138   : > { %v1930_v9 = vadd.f32 %v3005_v43, %v1891_v19  ;;  %v1961_v10 = vmax.f32 %v1929_v1, 0.0  ;;  %v1353_v48 = vadd.f32 %v1321_v45, %v1253_v3  ;;  %v1621_v41 = vmul.f32 %v2906_v17, %v3160_v16  ;;  %v3190_v46 = vld [vmem:[#allocation2 + $0x4a] sm:$0xff]  ;;  %v3198_v45 = vld [vmem:[#allocation2 + $0x52] sm:$0xff] }
 0x139   : > { %v1452_v13 = vadd.f32 %v1420_v52, %v1352_v4  ;;  %v1622_v30 = vmul.f32 %v2906_v17, %v3162_v32  ;;  %v1721_v57 = vmul.f32 %v2909_v18, %v3170_v31  ;;  %v1722_v49 = vmul.f32 %v2909_v18, %v3172_v33 }
 0x13a   : > { %v1962_v56 = vmax.f32 %v1930_v9, 0.0  ;;  %v1993_v61 = vmin.f32 %v1961_v10, 6.0  ;;  %v1453_v42 = vadd.f32 %v1421_v20, %v1353_v48  ;;  %v1821_v58 = vmul.f32 %v2959_v62, %v3180_v26 }
 0x13b   : > { %v1552_v14 = vadd.f32 %v1520_v59, %v1452_v13  ;;  %v1822_v38 = vmul.f32 %v2959_v62, %v3164_v11  ;;  %v1536_v40 = vadd.f32 %v3067_v55, %v3047_v24  ;;  %v1537_v19 = vadd.f32 %v3075_v8, %v3063_v53 }
 0x13c   : > { %v1994_v25 = vmin.f32 %v1962_v56, 6.0  ;;  %v1606_v1 = vmul.f32 %v2906_v17, %v3174_v44  ;;  %v1553_v4 = vadd.f32 %v1521_v12, %v1453_v42  ;;  %v1705_v20 = vmul.f32 %v2909_v18, %v3182_v21 }
 0x13d   : > { %v1653_v52 = vadd.f32 %v1621_v41, %v1552_v14  ;;  %v1706_v24 = vmul.f32 %v2909_v18, %v3184_v39  ;;  %v1637_v55 = vadd.f32 %v3079_v63, %v1536_v40  ;;  %v1805_v9 = vmul.f32 %v2959_v62, %v3190_v46 }
 0x13e   : > { %v2462_v53 = vpack.c.bf16 %v1994_v25, %v1993_v61  ;;  %v1638_v8 = vadd.f32 %v1606_v1, %v1537_v19  ;;  %v1654_v10 = vadd.f32 %v1622_v30, %v1553_v4  ;;  %v1806_v48 = vmul.f32 %v2959_v62, %v3198_v45 }
 0x13f   : > { %v1753_v59 = vadd.f32 %v1721_v57, %v1653_v52  ;;  %v1022_v12 = vmul.f32 %v3069_v5, %v2871_v35  ;;  %v1737_v13 = vadd.f32 %v1705_v20, %v1637_v55  ;;  %v1023_v63 = vmul.f32 %v3093_v27, %v2871_v35 }
 0x140   : > { %2464 = vmatprep.subr.msk.bf16.mxu1 %vm3202_vm4, %v2462_v53  ;;  %v1738_v41 = vadd.f32 %v1706_v24, %v1638_v8  ;;  %v1122_v56 = vmul.f32 %v3071_v6, %v2874_v36  ;;  %v3946_v30 = vpack.c.bf16 %v3035_v7, %v3031_v60  ;;  %v1754_v61 = vadd.f32 %v1722_v49, %v1654_v10 }
 0x141   : > { %v1853_v57 = vadd.f32 %v1821_v58, %v1753_v59  ;;  %v1123_v5 = vmul.f32 %v3095_v29, %v2874_v36  ;;  %v1222_v42 = vmul.f32 %v3108_v54, %v2881_v47  ;;  %v1837_v14 = vadd.f32 %v1805_v9, %v1737_v13 }
 0x142   : > { %2467 = vmatpush3.bf16.xpose.msk.msra.mxu1 %vm3202_vm4, %v3946_v30  ;;  %v1838_v25 = vadd.f32 %v1806_v48, %v1738_v41  ;;  %v1154_v27 = vadd.f32 %v1122_v56, %v1022_v12  ;;  %v1223_v6 = vmul.f32 %v3114_v15, %v2881_v47  ;;  %v1854_v40 = vadd.f32 %v1822_v38, %v1754_v61  ;;  %v3254_v41 = vld [vmem:[#allocation2 + $0x120] sm:$0xff]  ;;  %v3256_v61 = vld [vmem:[#allocation2 + $0x128] sm:$0xff] }
 0x143   : > { %v1892_v60 = vmul.f32 %v2998_v0, %v1853_v57  ;;  %v1155_v7 = vadd.f32 %v1123_v5, %v1023_v63  ;;  %v1322_v49 = vmul.f32 %v3160_v16, %v2913_v22  ;;  %v1876_v58 = vmul.f32 %v2998_v0, %v1837_v14  ;;  %v3260_v5 = vld [vmem:[#allocation2 + $0x122] sm:$0xff] }
 0x144   : > { %v1877_v29 = vmul.f32 %v2998_v0, %v1838_v25  ;;  %v1254_v19 = vadd.f32 %v1222_v42, %v1154_v27  ;;  %v1323_v54 = vmul.f32 %v3162_v32, %v2913_v22  ;;  %v1893_v1 = vmul.f32 %v2998_v0, %v1854_v40  ;;  %v3262_v42 = vld [vmem:[#allocation2 + $0x12a] sm:$0xff]  ;;  %v3266_v40 = vld [vmem:[#allocation2 + $0x121] sm:$0xff] }
 0x145   : > { %v1931_v4 = vadd.f32 %v3005_v43, %v1892_v60  ;;  %v1255_v15 = vadd.f32 %v1223_v6, %v1155_v7  ;;  %v1422_v38 = vmul.f32 %v3170_v31, %v2916_v23  ;;  %v1915_v52 = vadd.f32 %v3005_v43, %v1876_v58  ;;  %v3268_v60 = vld [vmem:[#allocation2 + $0x129] sm:$0xff] }
 0x146   : > { %v1916_v20 = vadd.f32 %v3005_v43, %v1877_v29  ;;  %v1354_v24 = vadd.f32 %v1322_v49, %v1254_v19  ;;  %v1423_v53 = vmul.f32 %v3172_v33, %v2916_v23  ;;  %v1932_v55 = vadd.f32 %v3005_v43, %v1893_v1 }
 0x147   : > { %v1963_v8 = vmax.f32 %v1931_v4, 0.0  ;;  %v1355_v9 = vadd.f32 %v1323_v54, %v1255_v15  ;;  %v1522_v10 = vmul.f32 %v3180_v26, %v2919_v28  ;;  %v1947_v59 = vmax.f32 %v1915_v52, 0.0 }
 0x148   : > { %v1948_v48 = vmax.f32 %v1916_v20, 0.0  ;;  %v1454_v12 = vadd.f32 %v1422_v38, %v1354_v24  ;;  %v1523_v13 = vmul.f32 %v3164_v11, %v2919_v28  ;;  %v1964_v63 = vmax.f32 %v1932_v55, 0.0 }
 0x149   : > { %v1995_v56 = vmin.f32 %v1963_v8, 6.0  ;;  %v1455_v30 = vadd.f32 %v1423_v53, %v1355_v9  ;;  %v1623_v57 = vmul.f32 %v2906_v17, %v3254_v41  ;;  %v1979_v14 = vmin.f32 %v1947_v59, 6.0  ;;  %v3948_v59 = vld [vmem:[#allocation7_spill] sm:$0xff] }
 0x14a   : > { %v1980_v25 = vmin.f32 %v1948_v48, 6.0  ;;  %v1554_v27 = vadd.f32 %v1522_v10, %v1454_v12  ;;  %v1624_v6 = vmul.f32 %v2906_v17, %v3256_v61  ;;  %v1996_v7 = vmin.f32 %v1964_v63, 6.0  ;;  %v3947_v10 = vld [vmem:[#allocation6_spill] sm:$0xff]  ;;  %v3302_v63 = vld [vmem:[#allocation2 + $0x68] sm:$0xff] }
 0x14b   : > { %v1555_v49 = vadd.f32 %v1523_v13, %v1455_v30  ;;  %v1723_v58 = vmul.f32 %v2909_v18, %v3266_v40  ;;  %v1724_v29 = vmul.f32 %v2909_v18, %v3268_v60  ;;  %v1823_v1 = vmul.f32 %v2959_v62, %v3260_v5  ;;  %v3306_v30 = vld [vmem:[#allocation2 + $0x69] sm:$0xff] }
 0x14c   : > { %v2471_v19 = vpack.c.bf16 %v1980_v25, %v1979_v14  ;;  %v1655_v54 = vadd.f32 %v1623_v57, %v1554_v27  ;;  %v1824_v4 = vmul.f32 %v2959_v62, %v3262_v42  ;;  %v2468_v15 = vpack.c.bf16 %v1996_v7, %v1995_v56  ;;  %v3304_v56 = vld [vmem:[#allocation2 + $0x61] sm:$0xff] }
 0x14d   : > { %v1656_v38 = vadd.f32 %v1624_v6, %v1555_v49  ;;  %v1006_v52 = vmul.f32 %v2921_v34, %v2871_v35  ;;  %v1007_v20 = vmul.f32 %v2940_v50, %v2871_v35  ;;  %v1106_v53 = vmul.f32 %v2923_v37, %v2874_v36  ;;  %v3296_v37 = vld [vmem:[#allocation2 + $0x60] sm:$0xff] }
 0x14e   : > { %v1755_v24 = vadd.f32 %v1723_v58, %v1655_v54  ;;  %v1107_v55 = vmul.f32 %v2942_v51, %v2874_v36  ;;  %v1206_v8 = vmul.f32 %v2964_v2, %v2881_v47  ;;  %2470 = vmatprep.subr.msk.bf16.mxu1 %vm3202_vm4, %v2468_v15  ;;  %v1207_v34 = vmul.f32 %v3947_v10, %v2881_v47  ;;  %v3314_v6 = vld [vmem:[#allocation2 + $0x62] sm:$0xff] }
 0x14f   : > { %v1756_v9 = vadd.f32 %v1724_v29, %v1656_v38  ;;  %v1306_v50 = vmul.f32 %v3948_v59, %v2913_v22  ;;  %v1307_v48 = vmul.f32 %v3174_v44, %v2913_v22  ;;  %2473 = vmatpush3.bf16.xpose.msk.msra.mxu1 %vm3202_vm4, %v2471_v19  ;;  %v1138_v2 = vadd.f32 %v1106_v53, %v1006_v52  ;;  %v3319_v19 = vld [vmem:[#allocation2 + $0x6a] sm:$0xff] }
 0x150   : > { %v1855_v51 = vadd.f32 %v1823_v1, %v1755_v24  ;;  %v1139_v12 = vadd.f32 %v1107_v55, %v1007_v20  ;;  %v1406_v13 = vmul.f32 %v3182_v21, %v2916_v23  ;;  %v1407_v14 = vmul.f32 %v3184_v39, %v2916_v23 }
 0x151   : > { %v1856_v57 = vadd.f32 %v1824_v4, %v1756_v9  ;;  %v1506_v25 = vmul.f32 %v3190_v46, %v2919_v28  ;;  %v1507_v27 = vmul.f32 %v3198_v45, %v2919_v28  ;;  %v1238_v49 = vadd.f32 %v1206_v8, %v1138_v2 }
 0x152   : > { %v1894_v7 = vmul.f32 %v2998_v0, %v1855_v51  ;;  %v1239_v58 = vadd.f32 %v1207_v34, %v1139_v12  ;;  %v1607_v29 = vmul.f32 %v2906_v17, %v3296_v37  ;;  %v1608_v1 = vmul.f32 %v2906_v17, %v3302_v63 }
 0x153   : > { %v1895_v54 = vmul.f32 %v2998_v0, %v1856_v57  ;;  %v1707_v4 = vmul.f32 %v2909_v18, %v3304_v56  ;;  %v1708_v15 = vmul.f32 %v2909_v18, %v3306_v30  ;;  %v1338_v52 = vadd.f32 %v1306_v50, %v1238_v49 }
 0x154   : > { %v1933_v38 = vadd.f32 %v3005_v43, %v1894_v7  ;;  %v1339_v20 = vadd.f32 %v1307_v48, %v1239_v58  ;;  %v1807_v24 = vmul.f32 %v2959_v62, %v3314_v6  ;;  %v1808_v55 = vmul.f32 %v2959_v62, %v3319_v19 }
 0x155   : > { %v1934_v53 = vadd.f32 %v3005_v43, %v1895_v54  ;;  %v1024_v8 = vmul.f32 %v3160_v16, %v2871_v35  ;;  %v1025_v9 = vmul.f32 %v3162_v32, %v2871_v35  ;;  %v1438_v34 = vadd.f32 %v1406_v13, %v1338_v52 }
 0x156   : > { %v1965_v10 = vmax.f32 %v1933_v38, 0.0  ;;  %v1439_v51 = vadd.f32 %v1407_v14, %v1339_v20  ;;  %v1124_v50 = vmul.f32 %v3170_v31, %v2874_v36  ;;  %v1125_v2 = vmul.f32 %v3172_v33, %v2874_v36 }
 0x157   : > { %v1966_v48 = vmax.f32 %v1934_v53, 0.0  ;;  %v1224_v12 = vmul.f32 %v3180_v26, %v2881_v47  ;;  %v1225_v57 = vmul.f32 %v3164_v11, %v2881_v47  ;;  %v1538_v7 = vadd.f32 %v1506_v25, %v1438_v34 }
 0x158   : > { %v1997_v16 = vmin.f32 %v1965_v10, 6.0  ;;  %v1539_v49 = vadd.f32 %v1507_v27, %v1439_v51  ;;  %v1156_v32 = vadd.f32 %v1124_v50, %v1024_v8  ;;  %v1157_v13 = vadd.f32 %v1125_v2, %v1025_v9  ;;  %v3362_v10 = vld [vmem:[#allocation2 + $0x139] sm:$0xff] }
 0x159   : > { %v1998_v58 = vmin.f32 %v1966_v48, 6.0  ;;  %v1324_v14 = vmul.f32 %v3254_v41, %v2913_v22  ;;  %v1325_v31 = vmul.f32 %v3256_v61, %v2913_v22  ;;  %v1639_v54 = vadd.f32 %v1607_v29, %v1538_v7  ;;  %v3358_v29 = vld [vmem:[#allocation2 + $0x138] sm:$0xff]  ;;  %v3378_v7 = vld [vmem:[#allocation2 + $0x142] sm:$0xff] }
 0x15a   : > { %v1640_v33 = vadd.f32 %v1608_v1, %v1539_v49  ;;  %v1256_v38 = vadd.f32 %v1224_v12, %v1156_v32  ;;  %v1424_v26 = vmul.f32 %v3266_v40, %v2916_v23  ;;  %v1257_v11 = vadd.f32 %v1225_v57, %v1157_v13  ;;  %v3360_v1 = vld [vmem:[#allocation2 + $0x140] sm:$0xff] }
 0x15b   : > { %v2474_v52 = vpack.c.bf16 %v1998_v58, %v1997_v16  ;;  %v1425_v25 = vmul.f32 %v3268_v60, %v2916_v23  ;;  %v1524_v27 = vmul.f32 %v3260_v5, %v2919_v28  ;;  %v1739_v20 = vadd.f32 %v1707_v4, %v1639_v54  ;;  %v3376_v16 = vld [vmem:[#allocation2 + $0x13a] sm:$0xff] }
 0x15c   : > { %v1740_v53 = vadd.f32 %v1708_v15, %v1640_v33  ;;  %v1356_v8 = vadd.f32 %v1324_v14, %v1256_v38  ;;  %v1525_v9 = vmul.f32 %v3262_v42, %v2919_v28  ;;  %v1357_v34 = vadd.f32 %v1325_v31, %v1257_v11  ;;  %v3370_v15 = vld [vmem:[#allocation2 + $0x141] sm:$0xff] }
 0x15d   : > { %2476 = vmatprep.subr.msk.bf16.mxu1 %vm3202_vm4, %v2474_v52  ;;  %v1625_v51 = vmul.f32 %v2906_v17, %v3358_v29  ;;  %v1626_v4 = vmul.f32 %v2906_v17, %v3360_v1  ;;  %v1725_v50 = vmul.f32 %v2909_v18, %v3362_v10  ;;  %v1839_v48 = vadd.f32 %v1807_v24, %v1739_v20 }
 0x15e   : > { %v1840_v2 = vadd.f32 %v1808_v55, %v1740_v53  ;;  %v1456_v12 = vadd.f32 %v1424_v26, %v1356_v8  ;;  %v1726_v57 = vmul.f32 %v2909_v18, %v3370_v15  ;;  %v1457_v49 = vadd.f32 %v1425_v25, %v1357_v34 }
 0x15f   : > { %v1825_v32 = vmul.f32 %v2959_v62, %v3376_v16  ;;  %v1826_v58 = vmul.f32 %v2959_v62, %v3378_v7  ;;  %v1008_v13 = vmul.f32 %v3948_v59, %v2871_v35  ;;  %v1878_v24 = vmul.f32 %v2998_v0, %v1839_v48 }
 0x160   : > { %v1879_v55 = vmul.f32 %v2998_v0, %v1840_v2  ;;  %v1556_v14 = vadd.f32 %v1524_v27, %v1456_v12  ;;  %v1009_v31 = vmul.f32 %v3174_v44, %v2871_v35  ;;  %v1557_v54 = vadd.f32 %v1525_v9, %v1457_v49  ;;  %v3406_v2 = vld [vmem:[#allocation2 + $0x78] sm:$0xff] }
 0x161   : > { %v1108_v33 = vmul.f32 %v3182_v21, %v2874_v36  ;;  %v1109_v38 = vmul.f32 %v3184_v39, %v2874_v36  ;;  %v1208_v26 = vmul.f32 %v3190_v46, %v2881_v47  ;;  %v1917_v59 = vadd.f32 %v3005_v43, %v1878_v24 }
 0x162   : > { %v1918_v52 = vadd.f32 %v3005_v43, %v1879_v55  ;;  %v1657_v11 = vadd.f32 %v1625_v51, %v1556_v14  ;;  %v1209_v25 = vmul.f32 %v3198_v45, %v2881_v47  ;;  %v1658_v27 = vadd.f32 %v1626_v4, %v1557_v54  ;;  %v3414_v14 = vld [vmem:[#allocation2 + $0x79] sm:$0xff] }
 0x163   : > { %v1140_v44 = vadd.f32 %v1108_v33, %v1008_v13  ;;  %v1141_v20 = vadd.f32 %v1109_v38, %v1009_v31  ;;  %v1308_v21 = vmul.f32 %v3296_v37, %v2913_v22  ;;  %v1949_v53 = vmax.f32 %v1917_v59, 0.0  ;;  %v3410_v13 = vld [vmem:[#allocation2 + $0x80] sm:$0xff] }
 0x164   : > { %v1950_v8 = vmax.f32 %v1918_v52, 0.0  ;;  %v1757_v39 = vadd.f32 %v1725_v50, %v1657_v11  ;;  %v1309_v46 = vmul.f32 %v3302_v63, %v2913_v22  ;;  %v1758_v9 = vadd.f32 %v1726_v57, %v1658_v27  ;;  %v3416_v31 = vld [vmem:[#allocation2 + $0x81] sm:$0xff] }
 0x165   : > { %v1240_v34 = vadd.f32 %v1208_v26, %v1140_v44  ;;  %v1241_v48 = vadd.f32 %v1209_v25, %v1141_v20  ;;  %v1408_v51 = vmul.f32 %v3304_v56, %v2916_v23  ;;  %v1981_v45 = vmin.f32 %v1949_v53, 6.0  ;;  %v3418_v54 = vld [vmem:[#allocation2 + $0x7a] sm:$0xff]  ;;  %v3425_v26 = vld [vmem:[#allocation2 + $0x82] sm:$0xff] }
 0x166   : > { %v1982_v4 = vmin.f32 %v1950_v8, 6.0  ;;  %v1857_v12 = vadd.f32 %v1825_v32, %v1757_v39  ;;  %v1409_v49 = vmul.f32 %v3306_v30, %v2916_v23  ;;  %v1858_v50 = vadd.f32 %v1826_v58, %v1758_v9 }
 0x167   : > { %v1340_v24 = vadd.f32 %v1308_v21, %v1240_v34  ;;  %v1341_v55 = vadd.f32 %v1309_v46, %v1241_v48  ;;  %v1508_v57 = vmul.f32 %v3314_v6, %v2919_v28  ;;  %v1509_v38 = vmul.f32 %v3319_v19, %v2919_v28 }
 0x168   : > { %v2477_v33 = vpack.c.bf16 %v1982_v4, %v1981_v45  ;;  %v1896_v32 = vmul.f32 %v2998_v0, %v1857_v12  ;;  %v1609_v58 = vmul.f32 %v2906_v17, %v3406_v2  ;;  %v1897_v59 = vmul.f32 %v2998_v0, %v1858_v50 }
 0x169   : > { %v1440_v52 = vadd.f32 %v1408_v51, %v1340_v24  ;;  %v1441_v11 = vadd.f32 %v1409_v49, %v1341_v55  ;;  %v1610_v25 = vmul.f32 %v2906_v17, %v3410_v13  ;;  %v1709_v44 = vmul.f32 %v2909_v18, %v3414_v14 }
 0x16a   : > { %2479 = vmatpush3.bf16.xpose.msk.msra.mxu1 %vm3202_vm4, %v2477_v33  ;;  %v1935_v27 = vadd.f32 %v3005_v43, %v1896_v32  ;;  %v1710_v20 = vmul.f32 %v2909_v18, %v3416_v31  ;;  %v1809_v21 = vmul.f32 %v2959_v62, %v3418_v54  ;;  %v1936_v53 = vadd.f32 %v3005_v43, %v1897_v59 }
 0x16b   : > { %v1540_v8 = vadd.f32 %v1508_v57, %v1440_v52  ;;  %v1541_v39 = vadd.f32 %v1509_v38, %v1441_v11  ;;  %v1810_v46 = vmul.f32 %v2959_v62, %v3425_v26  ;;  %v1026_v34 = vmul.f32 %v3254_v41, %v2871_v35  ;;  %v3462_v11 = vld [vmem:[#allocation2 + $0x158] sm:$0xff] }
 0x16c   : > { %v1967_v9 = vmax.f32 %v1935_v27, 0.0  ;;  %v1027_v48 = vmul.f32 %v3256_v61, %v2871_v35  ;;  %v1126_v51 = vmul.f32 %v3266_v40, %v2874_v36  ;;  %v1968_v45 = vmax.f32 %v1936_v53, 0.0  ;;  %v3466_v27 = vld [vmem:[#allocation2 + $0x159] sm:$0xff] }
 0x16d   : > { %v1641_v4 = vadd.f32 %v1609_v58, %v1540_v8  ;;  %v1642_v12 = vadd.f32 %v1610_v25, %v1541_v39  ;;  %v1127_v49 = vmul.f32 %v3268_v60, %v2874_v36  ;;  %v1226_v62 = vmul.f32 %v3260_v5, %v2881_v47  ;;  %v3460_v58 = vld [vmem:[#allocation2 + $0x150] sm:$0xff] }
 0x16e   : > { %v1999_v50 = vmin.f32 %v1967_v9, 6.0  ;;  %v1158_v24 = vadd.f32 %v1126_v51, %v1026_v34  ;;  %v1227_v41 = vmul.f32 %v3262_v42, %v2881_v47  ;;  %v2000_v55 = vmin.f32 %v1968_v45, 6.0  ;;  %v3464_v25 = vld [vmem:[#allocation2 + $0x151] sm:$0xff] }
 0x16f   : > { %v1741_v57 = vadd.f32 %v1709_v44, %v1641_v4  ;;  %v1742_v61 = vadd.f32 %v1710_v20, %v1642_v12  ;;  %v1159_v33 = vadd.f32 %v1127_v49, %v1027_v48  ;;  %v1326_v40 = vmul.f32 %v3358_v29, %v2913_v22  ;;  %v3474_v39 = vld [vmem:[#allocation2 + $0x152] sm:$0xff]  ;;  %v3482_v48 = vld [vmem:[#allocation2 + $0x15a] sm:$0xff] }
 0x170   : > { %v1258_v32 = vadd.f32 %v1226_v62, %v1158_v24  ;;  %v1327_v38 = vmul.f32 %v3360_v1, %v2913_v22  ;;  %v1426_v60 = vmul.f32 %v3362_v10, %v2916_v23  ;;  %v2480_v5 = vpack.c.bf16 %v2000_v55, %v1999_v50  ;;  %v3495_v24 = vld [vmem:[%s3928_s5 + $0x8] ss:$0 sm:$0xff] }
 0x171   : > { %v1841_v59 = vadd.f32 %v1809_v21, %v1741_v57  ;;  %v1842_v52 = vadd.f32 %v1810_v46, %v1742_v61  ;;  %v1259_v42 = vadd.f32 %v1227_v41, %v1159_v33  ;;  %v1427_v20 = vmul.f32 %v3370_v15, %v2916_v23 }
 0x172   : > { %v1358_v44 = vadd.f32 %v1326_v40, %v1258_v32  ;;  %v1526_v53 = vmul.f32 %v3376_v16, %v2919_v28  ;;  %v1527_v8 = vmul.f32 %v3378_v7, %v2919_v28  ;;  %2482 = vmatprep.subr.msk.bf16.mxu1 %vm3202_vm4, %v2480_v5  ;;  %v1627_v34 = vmul.f32 %v2906_v17, %v3460_v58 }
 0x173   : > { %v1880_v21 = vmul.f32 %v2998_v0, %v1841_v59  ;;  %v1881_v46 = vmul.f32 %v2998_v0, %v1842_v52  ;;  %v1359_v9 = vadd.f32 %v1327_v38, %v1259_v42  ;;  %v1628_v45 = vmul.f32 %v2906_v17, %v3462_v11 }
 0x174   : > { %v1458_v51 = vadd.f32 %v1426_v60, %v1358_v44  ;;  %v1727_v4 = vmul.f32 %v2909_v18, %v3464_v25  ;;  %v1728_v12 = vmul.f32 %v2909_v18, %v3466_v27  ;;  %v1827_v62 = vmul.f32 %v3495_v24, %v3474_v39 }
 0x175   : > { %v1919_v49 = vadd.f32 %v3005_v43, %v1880_v21  ;;  %v1920_v0 = vadd.f32 %v3005_v43, %v1881_v46  ;;  %v1459_v50 = vadd.f32 %v1427_v20, %v1359_v9  ;;  %v1828_v55 = vmul.f32 %v3495_v24, %v3482_v48  ;;  %v3521_v46 = vld [vmem:[#allocation2 + $0x98] sm:$0xff] }
 0x176   : > { %v1558_v41 = vadd.f32 %v1526_v53, %v1458_v51  ;;  %v1010_v57 = vmul.f32 %v3296_v37, %v2871_v35  ;;  %v1011_v61 = vmul.f32 %v3302_v63, %v2871_v35  ;;  %v1110_v40 = vmul.f32 %v3304_v56, %v2874_v36  ;;  %v3523_v9 = vld [vmem:[#allocation2 + $0x91] sm:$0xff] }
 0x177   : > { %v1951_v43 = vmax.f32 %v1919_v49, 0.0  ;;  %v1952_v33 = vmax.f32 %v1920_v0, 0.0  ;;  %v1559_v32 = vadd.f32 %v1527_v8, %v1459_v50  ;;  %v1111_v60 = vmul.f32 %v3306_v30, %v2874_v36  ;;  %v3517_v8 = vld [vmem:[#allocation2 + $0x90] sm:$0xff]  ;;  %v3529_v49 = vld [vmem:[#allocation2 + $0x99] sm:$0xff] }
 0x178   : > { %v1659_v38 = vadd.f32 %v1627_v34, %v1558_v41  ;;  %v1210_v5 = vmul.f32 %v3314_v6, %v2881_v47  ;;  %v1211_v59 = vmul.f32 %v3319_v19, %v2881_v47  ;;  %v1142_v63 = vadd.f32 %v1110_v40, %v1010_v57  ;;  %v3531_v0 = vld [vmem:[#allocation2 + $0x92] sm:$0xff]  ;;  %v3539_v57 = vld [vmem:[#allocation2 + $0x9a] sm:$0xff] }
 0x179   : > { %v1983_v37 = vmin.f32 %v1951_v43, 6.0  ;;  %v1984_v52 = vmin.f32 %v1952_v33, 6.0  ;;  %v1660_v42 = vadd.f32 %v1628_v45, %v1559_v32  ;;  %v1143_v20 = vadd.f32 %v1111_v60, %v1011_v61  ;;  %v3544_v61 = vld [vmem:[%s3929_s6] ss:$0 sm:$0xff] }
 0x17a   : > { %v1759_v44 = vadd.f32 %v1727_v4, %v1659_v38  ;;  %v1310_v53 = vmul.f32 %v3406_v2, %v2913_v22  ;;  %v1311_v56 = vmul.f32 %v3410_v13, %v2913_v22  ;;  %v1242_v6 = vadd.f32 %v1210_v5, %v1142_v63 }
 0x17b   : > { %v2483_v30 = vpack.c.bf16 %v1984_v52, %v1983_v37  ;;  %v1760_v21 = vadd.f32 %v1728_v12, %v1660_v42  ;;  %v1410_v19 = vmul.f32 %v3414_v14, %v2916_v23  ;;  %v1243_v51 = vadd.f32 %v1211_v59, %v1143_v20  ;;  %v3559_v59 = vld [vmem:[%s3930_s7] ss:$0 sm:$0xff] }
 0x17c   : > { %v1859_v34 = vadd.f32 %v1827_v62, %v1759_v44  ;;  %v1411_v45 = vmul.f32 %v3416_v31, %v2916_v23  ;;  %v1510_v4 = vmul.f32 %v3418_v54, %v2919_v28  ;;  %v1342_v50 = vadd.f32 %v1310_v53, %v1242_v6 }
 0x17d   : > { %2485 = vmatpush3.bf16.xpose.msk.msra.mxu1 %vm3202_vm4, %v2483_v30  ;;  %v1860_v12 = vadd.f32 %v1828_v55, %v1760_v21  ;;  %v1511_v41 = vmul.f32 %v3425_v26, %v2919_v28  ;;  %v1611_v62 = vmul.f32 %v2906_v17, %v3517_v8  ;;  %v1343_v33 = vadd.f32 %v1311_v56, %v1243_v51 }
 0x17e   : > { %v1898_v43 = vmul.f32 %v3544_v61, %v1859_v34  ;;  %v1612_v55 = vmul.f32 %v2906_v17, %v3521_v46  ;;  %v1711_v32 = vmul.f32 %v2909_v18, %v3523_v9  ;;  %v1442_v38 = vadd.f32 %v1410_v19, %v1342_v50 }
 0x17f   : > { %v1899_v40 = vmul.f32 %v3544_v61, %v1860_v12  ;;  %v1712_v60 = vmul.f32 %v2909_v18, %v3529_v49  ;;  %v1811_v5 = vmul.f32 %v3495_v24, %v3531_v0  ;;  %v1443_v52 = vadd.f32 %v1411_v45, %v1343_v33  ;;  %v3581_v33 = vld [vmem:[#allocation2 + $0x168] sm:$0xff] }
 0x180   : > { %v1937_v37 = vadd.f32 %v3559_v59, %v1898_v43  ;;  %v1812_v42 = vmul.f32 %v3495_v24, %v3539_v57  ;;  %v1028_v63 = vmul.f32 %v3358_v29, %v2871_v35  ;;  %v1542_v20 = vadd.f32 %v1510_v4, %v1442_v38  ;;  %v3589_v38 = vld [vmem:[#allocation2 + $0x169] sm:$0xff] }
 0x181   : > { %v1938_v44 = vadd.f32 %v3559_v59, %v1899_v40  ;;  %v1029_v53 = vmul.f32 %v3360_v1, %v2871_v35  ;;  %v1128_v56 = vmul.f32 %v3362_v10, %v2874_v36  ;;  %v1543_v21 = vadd.f32 %v1511_v41, %v1443_v52 }
 0x182   : > { %v1969_v30 = vmax.f32 %v1937_v37, 0.0  ;;  %v1129_v6 = vmul.f32 %v3370_v15, %v2874_v36  ;;  %v1228_v19 = vmul.f32 %v3376_v16, %v2881_v47  ;;  %v1643_v51 = vadd.f32 %v1611_v62, %v1542_v20 }
 0x183   : > { %v1970_v34 = vmax.f32 %v1938_v44, 0.0  ;;  %v1160_v29 = vadd.f32 %v1128_v56, %v1028_v63  ;;  %v1229_v45 = vmul.f32 %v3378_v7, %v2881_v47  ;;  %v1644_v12 = vadd.f32 %v1612_v55, %v1543_v21  ;;  %v3587_v55 = vld [vmem:[#allocation2 + $0x170] sm:$0xff] }
 0x184   : > { %v2001_v4 = vmin.f32 %v1969_v30, 6.0  ;;  %v1161_v1 = vadd.f32 %v1129_v6, %v1029_v53  ;;  %v1328_v10 = vmul.f32 %v3460_v58, %v2913_v22  ;;  %v1743_v41 = vadd.f32 %v1711_v32, %v1643_v51  ;;  %v3593_v44 = vld [vmem:[#allocation2 + $0x171] sm:$0xff] }
 0x185   : > { %v2002_v50 = vmin.f32 %v1970_v34, 6.0  ;;  %v1260_v43 = vadd.f32 %v1228_v19, %v1160_v29  ;;  %v1329_v15 = vmul.f32 %v3462_v11, %v2913_v22  ;;  %v1744_v16 = vadd.f32 %v1712_v60, %v1644_v12  ;;  %v3595_v60 = vld [vmem:[#allocation2 + $0x16a] sm:$0xff]  ;;  %v3601_v21 = vld [vmem:[#allocation2 + $0x172] sm:$0xff] }
 0x186   : > { %v1261_v62 = vadd.f32 %v1229_v45, %v1161_v1  ;;  %v1428_v40 = vmul.f32 %v3464_v25, %v2916_v23  ;;  %v1429_v7 = vmul.f32 %v3466_v27, %v2916_v23  ;;  %v1843_v32 = vadd.f32 %v1811_v5, %v1743_v41 }
 0x187   : > { %v2486_v37 = vpack.c.bf16 %v2002_v50, %v2001_v4  ;;  %v1360_v52 = vadd.f32 %v1328_v10, %v1260_v43  ;;  %v1528_v63 = vmul.f32 %v3474_v39, %v2919_v28  ;;  %v1844_v20 = vadd.f32 %v1812_v42, %v1744_v16 }
 0x188   : > { %v1361_v53 = vadd.f32 %v1329_v15, %v1261_v62  ;;  %v1529_v56 = vmul.f32 %v3482_v48, %v2919_v28  ;;  %v1629_v30 = vmul.f32 %v2906_v17, %v3581_v33  ;;  %v1882_v5 = vmul.f32 %v3544_v61, %v1843_v32 }
 0x189   : > { %2488 = vmatprep.subr.msk.bf16.mxu1 %vm3202_vm4, %v2486_v37  ;;  %v1460_v6 = vadd.f32 %v1428_v40, %v1360_v52  ;;  %v1630_v19 = vmul.f32 %v2906_v17, %v3587_v55  ;;  %v1729_v42 = vmul.f32 %v2909_v18, %v3589_v38  ;;  %v1883_v34 = vmul.f32 %v3544_v61, %v1844_v20 }
 0x18a   : > { %v1461_v51 = vadd.f32 %v1429_v7, %v1361_v53  ;;  %v1730_v29 = vmul.f32 %v2909_v18, %v3593_v44  ;;  %v1829_v45 = vmul.f32 %v3495_v24, %v3595_v60  ;;  %v1921_v4 = vadd.f32 %v3559_v59, %v1882_v5  ;;  %v3635_v5 = vld [vmem:[#allocation2 + $0xa8] sm:$0xff] }
 0x18b   : > { %v1560_v12 = vadd.f32 %v1528_v63, %v1460_v6  ;;  %v1830_v1 = vmul.f32 %v3495_v24, %v3601_v21  ;;  %v1012_v10 = vmul.f32 %v3406_v2, %v2871_v35  ;;  %v1922_v50 = vadd.f32 %v3559_v59, %v1883_v34  ;;  %v3643_v34 = vld [vmem:[#allocation2 + $0xa9] sm:$0xff] }
 0x18c   : > { %v1561_v41 = vadd.f32 %v1529_v56, %v1461_v51  ;;  %v1013_v43 = vmul.f32 %v3410_v13, %v2871_v35  ;;  %v1112_v15 = vmul.f32 %v3414_v14, %v2874_v36  ;;  %v1953_v16 = vmax.f32 %v1921_v4, 0.0 }
 0x18d   : > { %v1661_v62 = vadd.f32 %v1629_v30, %v1560_v12  ;;  %v1113_v40 = vmul.f32 %v3416_v31, %v2874_v36  ;;  %v1212_v7 = vmul.f32 %v3418_v54, %v2881_v47  ;;  %v1954_v37 = vmax.f32 %v1922_v50, 0.0 }
 0x18e   : > { %v1662_v32 = vadd.f32 %v1630_v19, %v1561_v41  ;;  %v1144_v2 = vadd.f32 %v1112_v15, %v1012_v10  ;;  %v1213_v52 = vmul.f32 %v3425_v26, %v2881_v47  ;;  %v1985_v63 = vmin.f32 %v1953_v16, 6.0  ;;  %v3647_v10 = vld [vmem:[#allocation2 + $0xb1] sm:$0xff] }
 0x18f   : > { %v1761_v20 = vadd.f32 %v1729_v42, %v1661_v62  ;;  %v1145_v13 = vadd.f32 %v1113_v40, %v1013_v43  ;;  %v1312_v14 = vmul.f32 %v3517_v8, %v2913_v22  ;;  %v1986_v53 = vmin.f32 %v1954_v37, 6.0  ;;  %v3641_v42 = vld [vmem:[#allocation2 + $0xb0] sm:$0xff] }
 0x190   : > { %v1762_v56 = vadd.f32 %v1730_v29, %v1662_v32  ;;  %v1244_v30 = vadd.f32 %v1212_v7, %v1144_v2  ;;  %v1313_v31 = vmul.f32 %v3521_v46, %v2913_v22  ;;  %v1412_v19 = vmul.f32 %v3523_v9, %v2916_v23  ;;  %v3656_v16 = vld [vmem:[#allocation2 + $0xb2] sm:$0xff] }
 0x191   : > { %v1861_v54 = vadd.f32 %v1829_v45, %v1761_v20  ;;  %v1245_v6 = vadd.f32 %v1213_v52, %v1145_v13  ;;  %v1413_v26 = vmul.f32 %v3529_v49, %v2916_v23  ;;  %v2489_v51 = vpack.c.bf16 %v1986_v53, %v1985_v63  ;;  %v3649_v45 = vld [vmem:[#allocation2 + $0xaa] sm:$0xff] }
 0x192   : > { %v1862_v29 = vadd.f32 %v1830_v1, %v1762_v56  ;;  %v1344_v4 = vadd.f32 %v1312_v14, %v1244_v30  ;;  %v1512_v12 = vmul.f32 %v3531_v0, %v2919_v28  ;;  %v1513_v43 = vmul.f32 %v3539_v57, %v2919_v28 }
 0x193   : > { %v1900_v50 = vmul.f32 %v3544_v61, %v1861_v54  ;;  %v1345_v41 = vadd.f32 %v1313_v31, %v1245_v6  ;;  %v1613_v15 = vmul.f32 %v2906_v17, %v3635_v5  ;;  %2491 = vmatpush3.bf16.xpose.msk.msra.mxu1 %vm3202_vm4, %v2489_v51  ;;  %v1614_v40 = vmul.f32 %v2906_v17, %v3641_v42 }
 0x194   : > { %v1901_v1 = vmul.f32 %v3544_v61, %v1862_v29  ;;  %v1444_v62 = vadd.f32 %v1412_v19, %v1344_v4  ;;  %v1713_v7 = vmul.f32 %v2909_v18, %v3643_v34  ;;  %v1714_v2 = vmul.f32 %v2909_v18, %v3647_v10 }
 0x195   : > { %v1939_v37 = vadd.f32 %v3559_v59, %v1900_v50  ;;  %v1445_v32 = vadd.f32 %v1413_v26, %v1345_v41  ;;  %v1813_v52 = vmul.f32 %v3495_v24, %v3649_v45  ;;  %v1814_v13 = vmul.f32 %v3495_v24, %v3656_v16 }
 0x196   : > { %v1940_v63 = vadd.f32 %v3559_v59, %v1901_v1  ;;  %v1544_v20 = vadd.f32 %v1512_v12, %v1444_v62  ;;  %v1030_v14 = vmul.f32 %v3460_v58, %v2871_v35  ;;  %v1031_v30 = vmul.f32 %v3462_v11, %v2871_v35  ;;  %v3693_v1 = vld [vmem:[#allocation2 + $0x188] sm:$0xff] }
 0x197   : > { %v1971_v53 = vmax.f32 %v1939_v37, 0.0  ;;  %v1545_v56 = vadd.f32 %v1513_v43, %v1445_v32  ;;  %v1130_v31 = vmul.f32 %v3464_v25, %v2874_v36  ;;  %v1131_v19 = vmul.f32 %v3466_v27, %v2874_v36  ;;  %v3697_v37 = vld [vmem:[#allocation2 + $0x181] sm:$0xff]  ;;  %v3699_v32 = vld [vmem:[#allocation2 + $0x189] sm:$0xff] }
 0x198   : > { %v1972_v54 = vmax.f32 %v1940_v63, 0.0  ;;  %v1645_v6 = vadd.f32 %v1613_v15, %v1544_v20  ;;  %v1230_v26 = vmul.f32 %v3474_v39, %v2881_v47  ;;  %v1231_v58 = vmul.f32 %v3482_v48, %v2881_v47  ;;  %v3691_v15 = vld [vmem:[#allocation2 + $0x180] sm:$0xff] }
 0x199   : > { %v2003_v51 = vmin.f32 %v1971_v53, 6.0  ;;  %v1646_v29 = vadd.f32 %v1614_v40, %v1545_v56  ;;  %v1162_v4 = vadd.f32 %v1130_v31, %v1030_v14  ;;  %v1163_v11 = vadd.f32 %v1131_v19, %v1031_v30  ;;  %v3705_v53 = vld [vmem:[#allocation2 + $0x182] sm:$0xff]  ;;  %v3707_v56 = vld [vmem:[#allocation2 + $0x18a] sm:$0xff] }
 0x19a   : > { %v2004_v12 = vmin.f32 %v1972_v54, 6.0  ;;  %v1745_v50 = vadd.f32 %v1713_v7, %v1645_v6  ;;  %v1330_v25 = vmul.f32 %v3581_v33, %v2913_v22  ;;  %v1331_v27 = vmul.f32 %v3587_v55, %v2913_v22 }
 0x19b   : > { %v1746_v41 = vadd.f32 %v1714_v2, %v1646_v29  ;;  %v1262_v43 = vadd.f32 %v1230_v26, %v1162_v4  ;;  %v1430_v39 = vmul.f32 %v3589_v38, %v2916_v23  ;;  %v1263_v40 = vadd.f32 %v1231_v58, %v1163_v11 }
 0x19c   : > { %v2492_v62 = vpack.c.bf16 %v2004_v12, %v2003_v51  ;;  %v1845_v48 = vadd.f32 %v1813_v52, %v1745_v50  ;;  %v1431_v7 = vmul.f32 %v3593_v44, %v2916_v23  ;;  %v1530_v20 = vmul.f32 %v3595_v60, %v2919_v28 }
 0x19d   : > { %v1846_v2 = vadd.f32 %v1814_v13, %v1746_v41  ;;  %v1362_v63 = vadd.f32 %v1330_v25, %v1262_v43  ;;  %v1531_v14 = vmul.f32 %v3601_v21, %v2919_v28  ;;  %v1363_v30 = vadd.f32 %v1331_v27, %v1263_v40 }
 0x19e   : > { %2494 = vmatprep.subr.msk.bf16.mxu1 %vm3202_vm4, %v2492_v62  ;;  %v1884_v52 = vmul.f32 %v3544_v61, %v1845_v48  ;;  %v1631_v13 = vmul.f32 %v2906_v17, %v3691_v15  ;;  %v1632_v31 = vmul.f32 %v2906_v17, %v3693_v1  ;;  %v1731_v19 = vmul.f32 %v2909_v18, %v3697_v37 }
 0x19f   : > { %v1885_v54 = vmul.f32 %v3544_v61, %v1846_v2  ;;  %v1462_v6 = vadd.f32 %v1430_v39, %v1362_v63  ;;  %v1732_v26 = vmul.f32 %v2909_v18, %v3699_v32  ;;  %v1463_v29 = vadd.f32 %v1431_v7, %v1363_v30 }
 0x1a0   : > { %v1923_v51 = vadd.f32 %v3559_v59, %v1884_v52  ;;  %v1831_v4 = vmul.f32 %v3495_v24, %v3705_v53  ;;  %v1832_v58 = vmul.f32 %v3495_v24, %v3707_v56  ;;  %v1014_v11 = vmul.f32 %v3517_v8, %v2871_v35 }
 0x1a1   : > { %v1924_v12 = vadd.f32 %v3559_v59, %v1885_v54  ;;  %v1562_v50 = vadd.f32 %v1530_v20, %v1462_v6  ;;  %v1015_v25 = vmul.f32 %v3521_v46, %v2871_v35  ;;  %v1563_v43 = vadd.f32 %v1531_v14, %v1463_v29  ;;  %v3745_v54 = vld [vmem:[#allocation2 + $0xc0] sm:$0xff] }
 0x1a2   : > { %v1955_v41 = vmax.f32 %v1923_v51, 0.0  ;;  %v1114_v27 = vmul.f32 %v3523_v9, %v2874_v36  ;;  %v1115_v39 = vmul.f32 %v3529_v49, %v2874_v36  ;;  %v1214_v40 = vmul.f32 %v3531_v0, %v2881_v47 }
 0x1a3   : > { %v1956_v62 = vmax.f32 %v1924_v12, 0.0  ;;  %v1663_v48 = vadd.f32 %v1631_v13, %v1562_v50  ;;  %v1215_v7 = vmul.f32 %v3539_v57, %v2881_v47  ;;  %v1664_v2 = vadd.f32 %v1632_v31, %v1563_v43  ;;  %v3747_v57 = vld [vmem:[#allocation2 + $0xc8] sm:$0xff] }
 0x1a4   : > { %v1987_v8 = vmin.f32 %v1955_v41, 6.0  ;;  %v1146_v63 = vadd.f32 %v1114_v27, %v1014_v11  ;;  %v1147_v46 = vadd.f32 %v1115_v39, %v1015_v25  ;;  %v1314_v9 = vmul.f32 %v3635_v5, %v2913_v22  ;;  %v3749_v31 = vld [vmem:[#allocation2 + $0xc1] sm:$0xff]  ;;  %v3761_v43 = vld [vmem:[#allocation2 + $0xca] sm:$0xff] }
 0x1a5   : > { %v1988_v20 = vmin.f32 %v1956_v62, 6.0  ;;  %v1763_v14 = vadd.f32 %v1731_v19, %v1663_v48  ;;  %v1315_v49 = vmul.f32 %v3641_v42, %v2913_v22  ;;  %v1764_v52 = vadd.f32 %v1732_v26, %v1664_v2  ;;  %v3755_v26 = vld [vmem:[#allocation2 + $0xc9] sm:$0xff] }
 0x1a6   : > { %v1246_v30 = vadd.f32 %v1214_v40, %v1146_v63  ;;  %v1247_v13 = vadd.f32 %v1215_v7, %v1147_v46  ;;  %v1414_v0 = vmul.f32 %v3643_v34, %v2916_v23  ;;  %v1415_v51 = vmul.f32 %v3647_v10, %v2916_v23  ;;  %v3759_v41 = vld [vmem:[#allocation2 + $0xc2] sm:$0xff] }
 0x1a7   : > { %v2495_v6 = vpack.c.bf16 %v1988_v20, %v1987_v8  ;;  %v1863_v19 = vadd.f32 %v1831_v4, %v1763_v14  ;;  %v1514_v29 = vmul.f32 %v3649_v45, %v2919_v28  ;;  %v1864_v12 = vadd.f32 %v1832_v58, %v1764_v52 }
 0x1a8   : > { %v1346_v50 = vadd.f32 %v1314_v9, %v1246_v30  ;;  %v1347_v11 = vadd.f32 %v1315_v49, %v1247_v13  ;;  %v1515_v25 = vmul.f32 %v3656_v16, %v2919_v28  ;;  %v1615_v27 = vmul.f32 %v2906_v17, %v3745_v54 }
 0x1a9   : > { %2497 = vmatpush3.bf16.xpose.msk.msra.mxu1 %vm3202_vm4, %v2495_v6  ;;  %v1902_v4 = vmul.f32 %v3544_v61, %v1863_v19  ;;  %v1616_v58 = vmul.f32 %v2906_v17, %v3747_v57  ;;  %v1715_v39 = vmul.f32 %v2909_v18, %v3749_v31  ;;  %v1903_v62 = vmul.f32 %v3544_v61, %v1864_v12 }
 0x1aa   : > { %v1446_v48 = vadd.f32 %v1414_v0, %v1346_v50  ;;  %v1447_v40 = vadd.f32 %v1415_v51, %v1347_v11  ;;  %v1716_v7 = vmul.f32 %v2909_v18, %v3755_v26  ;;  %v1815_v2 = vmul.f32 %v3495_v24, %v3759_v41 }
 0x1ab   : > { %v1941_v8 = vadd.f32 %v3559_v59, %v1902_v4  ;;  %v1816_v63 = vmul.f32 %v3495_v24, %v3761_v43  ;;  %v1032_v46 = vmul.f32 %v3581_v33, %v2871_v35  ;;  %v1942_v20 = vadd.f32 %v3559_v59, %v1903_v62  ;;  %v1598_v62 = vld [vmem:[#allocation2 + $0x1a0] sm:$0xff] }
 0x1ac   : > { %v1546_v14 = vadd.f32 %v1514_v29, %v1446_v48  ;;  %v1547_v9 = vadd.f32 %v1515_v25, %v1447_v40  ;;  %v1033_v49 = vmul.f32 %v3587_v55, %v2871_v35  ;;  %v1132_v30 = vmul.f32 %v3589_v38, %v2874_v36 }
 0x1ad   : > { %v1973_v52 = vmax.f32 %v1941_v8, 0.0  ;;  %v1133_v13 = vmul.f32 %v3593_v44, %v2874_v36  ;;  %v1232_v0 = vmul.f32 %v3595_v60, %v2881_v47  ;;  %v1974_v6 = vmax.f32 %v1942_v20, 0.0 }
 0x1ae   : > { %v1647_v19 = vadd.f32 %v1615_v27, %v1546_v14  ;;  %v1648_v33 = vadd.f32 %v1616_v58, %v1547_v9  ;;  %v1233_v51 = vmul.f32 %v3601_v21, %v2881_v47  ;;  %v1164_v12 = vadd.f32 %v1132_v30, %v1032_v46  ;;  %v1597_v58 = vld [vmem:[#allocation2 + $0x198] sm:$0xff]  ;;  %v1698_v46 = vld [vmem:[#allocation2 + $0x1a1] sm:$0xff] }
 0x1af   : > { %v2005_v29 = vmin.f32 %v1973_v52, 6.0  ;;  %v1165_v50 = vadd.f32 %v1133_v13, %v1033_v49  ;;  %v1332_v55 = vmul.f32 %v3691_v15, %v2913_v22  ;;  %v2006_v11 = vmin.f32 %v1974_v6, 6.0  ;;  %v1697_v15 = vld [vmem:[#allocation2 + $0x199] sm:$0xff]  ;;  %v1798_v13 = vld [vmem:[#allocation2 + $0x1a2] sm:$0xff] }
 0x1b0   : > { %v1747_v38 = vadd.f32 %v1715_v39, %v1647_v19  ;;  %v1748_v25 = vadd.f32 %v1716_v7, %v1648_v33  ;;  %v1333_v44 = vmul.f32 %v3693_v1, %v2913_v22  ;;  %v1264_v4 = vadd.f32 %v1232_v0, %v1164_v12  ;;  %v1797_v14 = vld [vmem:[#allocation2 + $0x19a] sm:$0xff] }
 0x1b1   : > { %v1265_v60 = vadd.f32 %v1233_v51, %v1165_v50  ;;  %v1432_v27 = vmul.f32 %v3697_v37, %v2916_v23  ;;  %v1433_v21 = vmul.f32 %v3699_v32, %v2916_v23  ;;  %v2498_v48 = vpack.c.bf16 %v2006_v11, %v2005_v29 }
 0x1b2   : > { %v1847_v40 = vadd.f32 %v1815_v2, %v1747_v38  ;;  %v1848_v8 = vadd.f32 %v1816_v63, %v1748_v25  ;;  %v1364_v39 = vadd.f32 %v1332_v55, %v1264_v4  ;;  %v1532_v1 = vmul.f32 %v3705_v53, %v2919_v28 }
 0x1b3   : > { %v1365_v7 = vadd.f32 %v1333_v44, %v1265_v60  ;;  %v1533_v20 = vmul.f32 %v3707_v56, %v2919_v28  ;;  %2500 = vmatprep.subr.msk.bf16.mxu1 %vm3202_vm4, %v2498_v48  ;;  %v1633_v2 = vmul.f32 %v2906_v17, %v1597_v58  ;;  %v1634_v63 = vmul.f32 %v2906_v17, %v1598_v62 }
 0x1b4   : > { %v1886_v37 = vmul.f32 %v3544_v61, %v1847_v40  ;;  %v1887_v32 = vmul.f32 %v3544_v61, %v1848_v8  ;;  %v1464_v9 = vadd.f32 %v1432_v27, %v1364_v39  ;;  %v1733_v52 = vmul.f32 %v2909_v18, %v1697_v15  ;;  %v1581_v15 = vld [vmem:[#allocation2 + $0xd8] sm:$0xff]  ;;  %v1582_v39 = vld [vmem:[#allocation2 + $0xe0] sm:$0xff] }
 0x1b5   : > { %v1465_v49 = vadd.f32 %v1433_v21, %v1365_v7  ;;  %v1734_v53 = vmul.f32 %v2909_v18, %v1698_v46  ;;  %v1833_v0 = vmul.f32 %v3495_v24, %v1797_v14  ;;  %v1016_v6 = vmul.f32 %v3635_v5, %v2871_v35 }
 0x1b6   : > { %v1925_v56 = vadd.f32 %v3559_v59, %v1886_v37  ;;  %v1926_v30 = vadd.f32 %v3559_v59, %v1887_v32  ;;  %v1564_v19 = vadd.f32 %v1532_v1, %v1464_v9  ;;  %v1017_v51 = vmul.f32 %v3641_v42, %v2871_v35  ;;  %v1682_v32 = vld [vmem:[#allocation2 + $0xe1] sm:$0xff] }
 0x1b7   : > { %v1565_v33 = vadd.f32 %v1533_v20, %v1465_v49  ;;  %v1116_v29 = vmul.f32 %v3643_v34, %v2874_v36  ;;  %v1117_v55 = vmul.f32 %v3647_v10, %v2874_v36  ;;  %v1216_v11 = vmul.f32 %v3649_v45, %v2881_v47  ;;  %v1781_v49 = vld [vmem:[#allocation2 + $0xda] sm:$0xff] }
 0x1b8   : > { %v1957_v12 = vmax.f32 %v1925_v56, 0.0  ;;  %v1958_v50 = vmax.f32 %v1926_v30, 0.0  ;;  %v1665_v38 = vadd.f32 %v1633_v2, %v1564_v19  ;;  %v1834_v5 = vmul.f32 %v3495_v24, %v1798_v13  ;;  %v1782_v56 = vld [vmem:[#allocation2 + $0xe2] sm:$0xff] }
 0x1b9   : > { %v1666_v25 = vadd.f32 %v1634_v63, %v1565_v33  ;;  %v1148_v44 = vadd.f32 %v1116_v29, %v1016_v6  ;;  %v1149_v27 = vadd.f32 %v1117_v55, %v1017_v51  ;;  %v1217_v35 = vmul.f32 %v3656_v16, %v2881_v47  ;;  %v2181_v63 = vld [vmem:[%s3932_s9] sm:$0xff] }
 0x1ba   : > { %v1989_v4 = vmin.f32 %v1957_v12, 6.0  ;;  %v1990_v60 = vmin.f32 %v1958_v50, 6.0  ;;  %v1765_v42 = vadd.f32 %v1733_v52, %v1665_v38  ;;  %v1316_v36 = vmul.f32 %v3745_v54, %v2913_v22  ;;  %v2009_v54 = vld [vmem:[%s3931_s8] sm:$0xf] }
 0x1bb   : > { %v1766_v34 = vadd.f32 %v1734_v53, %v1666_v25  ;;  %v1248_v21 = vadd.f32 %v1216_v11, %v1148_v44  ;;  %v1249_v58 = vadd.f32 %v1217_v35, %v1149_v27  ;;  %v1317_v45 = vmul.f32 %v3747_v57, %v2913_v22  ;;  %v2189_v51 = vld [vmem:[%s3933_s10] sm:$0xff] }
 0x1bc   : > { %v2501_v10 = vpack.c.bf16 %v1990_v60, %v1989_v4  ;;  %v1865_v62 = vadd.f32 %v1833_v0, %v1765_v42  ;;  %v1416_v8 = vmul.f32 %v3749_v31, %v2916_v23  ;;  %v1417_v16 = vmul.f32 %v3755_v26, %v2916_v23  ;;  %v1681_v23 = vld [vmem:[#allocation2 + $0xd9] sm:$0xff] }
 0x1bd   : > { %v1866_v48 = vadd.f32 %v1834_v5, %v1766_v34  ;;  %v1348_v40 = vadd.f32 %v1316_v36, %v1248_v21  ;;  %v1349_v47 = vadd.f32 %v1317_v45, %v1249_v58  ;;  %v1516_v31 = vmul.f32 %v3759_v41, %v2919_v28 }
 0x1be   : > { %2503 = vmatpush3.bf16.xpose.msk.msra.mxu1 %vm3202_vm4, %v2501_v10  ;;  %v1904_v22 = vmul.f32 %v3544_v61, %v1865_v62  ;;  %v1517_v1 = vmul.f32 %v3761_v43, %v2919_v28  ;;  %v1617_v20 = vmul.f32 %v2906_v17, %v1581_v15  ;;  %v2010_v2 = vunpack.c.l.bf16 %v2009_v54 }
 0x1bf   : > { %v1905_v57 = vmul.f32 %v3544_v61, %v1866_v48  ;;  %v1448_v46 = vadd.f32 %v1416_v8, %v1348_v40  ;;  %v1449_v7 = vadd.f32 %v1417_v16, %v1349_v47  ;;  %v1618_v9 = vmul.f32 %v2906_v17, %v1582_v39 }
 0x1c0   : > { %v1943_v26 = vadd.f32 %v3559_v59, %v1904_v22  ;;  %v1717_v53 = vmul.f32 %v2909_v18, %v1681_v23  ;;  %2426 = vmatprep.mubr.msk.f32.mxu1 %vm875_vm2, %v2010_v2  ;;  %v2637_v30 = vmov 0   ;;  %v1718_v0 = vmul.f32 %v2909_v18, %v1682_v32 }
 0x1c1   : > { %v1944_v14 = vadd.f32 %v3559_v59, %v1905_v57  ;;  %v1548_v37 = vadd.f32 %v1516_v31, %v1448_v46  ;;  %v1549_v41 = vadd.f32 %v1517_v1, %v1449_v7  ;;  %2552 = vset.pattern.permute.xlu0 %v2637_v30  ;;  %v1817_v17 = vmul.f32 %v3495_v24, %v1781_v49 }
 0x1c2   : > { %v1975_v52 = vmax.f32 %v1943_v26, 0.0  ;;  %2184 = vperm.xlu0 %2552, %v2181_v63   ;;  %v1818_v12 = vmul.f32 %v3495_v24, %v1782_v56 }
 0x1c3   : > { %v1976_v28 = vmax.f32 %v1944_v14, 0.0  ;;  %v1649_v43 = vadd.f32 %v1617_v20, %v1548_v37  ;;  %v1650_v13 = vadd.f32 %v1618_v9, %v1549_v41 }
 0x1c4   : > { %v2007_v6 = vmin.f32 %v1975_v52, 6.0 }
 0x1c5   : > { %v2008_v19 = vmin.f32 %v1976_v28, 6.0  ;;  %v1749_v33 = vadd.f32 %v1717_v53, %v1649_v43  ;;  %v1750_v29 = vadd.f32 %v1718_v0, %v1650_v13 }
 0x1c6   : > { %2192 = vperm.xlu0 %2552, %v2189_v51  }
 0x1c7   : > { %v2504_v50 = vpack.c.bf16 %v2008_v19, %v2007_v6  ;;  %v1849_v55 = vadd.f32 %v1817_v17, %v1749_v33  ;;  %v1850_v11 = vadd.f32 %v1818_v12, %v1750_v29 }
 0x1c9   : > { %2506 = vmatprep.subr.msk.bf16.mxu1 %vm3202_vm4, %v2504_v50  ;;  %v1888_v18 = vmul.f32 %v3544_v61, %v1849_v55  ;;  %v1889_v38 = vmul.f32 %v3544_v61, %v1850_v11 }
 0x1cb   : > { %v1927_v25 = vadd.f32 %v3559_v59, %v1888_v18  ;;  %v1928_v5 = vadd.f32 %v3559_v59, %v1889_v38  ;;  %v2197_v59 = vld [vmem:[%s404_s24] sm:$0xff]  ;;  %s2572_s24 = scalar_lea.vmem %s3883_s12, 256 }
 0x1cc   : > { %v2198_v34 = vunpack.c.l.bf16 %v2197_v59  ;;  %v2199_v3 = vunpack.c.h.bf16 %v2197_v59  ;;  %p2573_p11 = scmp.ne.s32.totalorder %s3883_s12, %s2572_s24  ;;  %p2580_p1 = scmp.lt.s32.totalorder %s2578_s0, %s2572_s24 }
 0x1cd   : > { %v1959_v44 = vmax.f32 %v1927_v25, 0.0  ;;  %v1960_v4 = vmax.f32 %v1928_v5, 0.0 }
 0x1ce   : > { %p2574_p12 = pnand %p2573_p11, %p2737_p5  ;;  %p2581_p2 = por %p2580_p1, %p2579_p0 }
 0x1cf   : > { %v1991_v24 = vmin.f32 %v1959_v44, 6.0  ;;  %v1992_v60 = vmin.f32 %v1960_v4, 6.0 }
 0x1d0   : > { %p2575_p13 = pneg %p2574_p12 }
 0x1d1   : > { %v2507_v27 = vpack.c.bf16 %v1992_v60, %v1991_v24 }
 0x1d2   : > { %p2582_p3 = pnand %p2581_p2, %p2575_p13 }
 0x1d3   : > { %2509 = vmatpush3.bf16.xpose.msk.msra.mxu1 %vm3202_vm4, %v2507_v27 }
 0x1da   : > { %2427 = vmatmul.mubr.msk.f32.vlgmr.msra.gmra.mrb[0].mxu1 %vm875_vm2, %v2010_v2 }
 0x241   : > { %v2185_v61 = vpop.permute.xlu0 %2184 }
 0x245   : > { %v2193_v36 = vpop.permute.xlu0 %2192 }
 0x2ad   : > { %v2176_v35 = vpop.f32.mrb[0].mxu1 }
 0x2ae   : > { %v2187_v42 = vmul.f32 %v2185_v61, %v2176_v35  ;;  %v2178_v21 = vpop.f32.mrb[1].mxu1 }
 0x2af   : > { %v2188_v10 = vmul.f32 %v2185_v61, %v2178_v21 }
 0x2b0   : > { %v2195_v58 = vadd.f32 %v2193_v36, %v2187_v42 }
 0x2b1   : > { %v2196_v45 = vadd.f32 %v2193_v36, %v2188_v10 }
 0x2b2   : > { %v2200_v62 = vadd.f32 %v2198_v34, %v2195_v58 }
 0x2b3   : > { %v2201_v48 = vadd.f32 %v2199_v3, %v2196_v45 }
 0x2b4   : > { %2202 = vst [vmem:[%s394_s30] sm:$0xff] %v2200_v62 }
 0x2b5   : > { %2203 = vst [vmem:[%s394_s30 + $0x8] sm:$0xff] %v2201_v48 }
 0x2b6   : > { %2585 = shalt.err (!%p2582_p3)
}
 0x2b7   : > { %s2586_s15 = scalar_lea.hbm %s3881_s16, 256  ;;  %s2590_s13 = scalar_lea.hbm %s3934_s11, 512 }
 0x2b8   : > { %p2587_p4 = scmp.ne.s32.totalorder %s3881_s16, %s2586_s15  ;;  %p2591_p9 = scmp.lt.u32.totalorder %s3881_s16, %s3934_s11 }
 0x2b9   : > { %p2592_p10 = scmp.lt.u32.totalorder %s2590_s13, %s2586_s15  ;;  %p2594_p12 = scmp.lt.u32.totalorder %s2586_s15, %s3881_s16 }
 0x2ba   : > { %p2588_p7 = pnand %p2587_p4, %p2737_p5 }
 0x2bb   : > { %p2593_p11 = por %p2592_p10, %p2591_p9 }
 0x2bc   : > { %p2589_p8 = pneg %p2588_p7 }
 0x2bd   : > { %p2595_p13 = por %p2594_p12, %p2593_p11 }
 0x2bf   : > { %p2596_p0 = pnand %p2595_p13, %p2589_p8 }
 0x2c1   : > { %2599 = shalt.err (!%p2596_p0)
}
 0x2c2   : > { %2511 = dma.vmem_to_hbm [thread:$0]  (%p2737_p5), %s3883_s12, 256, %s3881_s16, %s2205_s22  }
 0x2c3 PF: > { %p2517_p1 = scmp.ge.s32.totalorder %s2634_s20, 2  ;;  %s2231_s0 = sand.u32 1, %s2622_s17  }
 0x2c4   : > { %s2232_s24 = scalar_lea.sflag [#allocation4], %s2231_s0 }
 0x2c5   : > { %p2514_p2 = pnand %p2517_p1, %p2741_p6 }
 0x2c7   : > { %2617 = dma.done.wait (!%p2514_p2), %s2232_s24, 256  }
 0x2c8   : > { %2619 = vsyncadd (!%p2514_p2), %s2232_s24, 4294967040  ;;  %p21_p3 = scmp.ge.s32.totalorder %s2724_s23, 4   ;;  %s3949_s17 = smov %s2626_s18 }
 0x2c9   : > { %s3950_s18 = smov %s2630_s19  ;;  %s3951_s19 = smov %s2735_s26 }
 0x2ca   : > { %s3952_s20 = smov %s2724_s23  ;;  %23 = sbr.rel (!%p21_p3) target bundleno = 5 (0x5), region = 104 }
 0x2d1   :  { %2237 = vsyncpa [#allocation4], 1 }
 0x2d2   :  { %2239 = vsyncpa [#allocation4 + $0x1], 1 }

</bundles_post_ra>
